<compile_context>
chip_gen: v7x
topology: tpu7x:2x2x1
jax: 0.10.0
libtpu: 0.0.40
codegen_flags: <defaults>
</compile_context>

<pallas_src>
import functools

import jax
import jax.numpy as jnp
from jax.experimental import pallas as pl
from jax.experimental.pallas import tpu as pltpu

N_IN = 25
N_IN_PAD = 32     # sublane-padded contraction dim (fused weight rows)
N_OUT = 1200
N_PAD = 1280      # lane-padded output dim (multiple of 128)
H, W, C = 20, 20, 3


def generator_kernel(amp_ref, x_ref, w_ref, b_ref, o_ref):
    # (TB, 32) @ (32, 1280) MXU pass, f32 accumulate.
    y = jnp.dot(x_ref[...], w_ref[...], preferred_element_type=jnp.float32)
    # bias + scale (VPU), tanh (EUP). Padded lanes/rows stay tanh(0) = 0.
    o_ref[...] = jnp.tanh((y + b_ref[...]) * amp_ref[0])


def init_params(key):
    """Deterministic synthetic params with the nn.Linear shapes.
    Returned weights are already transposed to (in, out)."""
    k1, k2, k3, k4 = jax.random.split(key, 4)
    w1 = jax.random.normal(k1, (100, 25), jnp.float32) * (1.0 / 25.0) ** 0.5
    b1 = jax.random.normal(k2, (100,), jnp.float32) * 0.01
    w2 = jax.random.normal(k3, (1200, 100), jnp.float32) * (1.0 / 100.0) ** 0.5
    b2 = jax.random.normal(k4, (1200,), jnp.float32) * 0.01
    return (w1.T, b1, w2.T, b2)


def fuse_params(params):
    """Fold fc and fc2 into one padded (32, 1280) weight + (1, 1280) bias."""
    w1_t, b1, w2_t, b2 = params
    w_comb = w1_t @ w2_t                       # (25, 1200)
    b_comb = b1 @ w2_t + b2                    # (1200,)
    w_pad = jnp.zeros((N_IN_PAD, N_PAD), jnp.float32).at[:N_IN, :N_OUT].set(w_comb)
    b_pad = jnp.zeros((1, N_PAD), jnp.float32).at[:, :N_OUT].set(b_comb)
    return w_pad, b_pad


def _generator_pallas(amp, x_pad, w_pad, b_pad, tb):
    """x_pad: (Bp, 32) with Bp a multiple of tb. Returns (Bp, 1280) f32."""
    bp = x_pad.shape[0]
    grid = (bp // tb,)
    return pl.pallas_call(
        generator_kernel,
        out_shape=jax.ShapeDtypeStruct((bp, N_PAD), jnp.float32),
        grid_spec=pltpu.PrefetchScalarGridSpec(
            num_scalar_prefetch=1,            # binary_amp -> SMEM
            grid=grid,
            in_specs=[
                # batch tile marches over the grid
                pl.BlockSpec((tb, N_IN_PAD), lambda b, amp: (b, 0)),
                # fused weight / bias: constant index_map -> VMEM-resident
                pl.BlockSpec((N_IN_PAD, N_PAD), lambda b, amp: (0, 0)),
                pl.BlockSpec((1, N_PAD), lambda b, amp: (0, 0)),
            ],
            out_specs=pl.BlockSpec((tb, N_PAD), lambda b, amp: (b, 0)),
        ),
        compiler_params=pltpu.CompilerParams(
            dimension_semantics=("parallel",)),   # shards batch across TCs (v7x)
    )(amp, x_pad, w_pad, b_pad)


@jax.jit
def generator_forward(ipt, binary_amp, w_pad, b_pad):
    """Module semantics: tanh(fc2(fc(ipt.view(-1))) * binary_amp).view(20, 20, 3)."""
    x = ipt.reshape(1, N_IN).astype(jnp.float32)               # .view(-1)
    # pad to an 8-row, 32-lane tile so load/store are sublane/lane dense
    x_pad = jnp.zeros((8, N_IN_PAD), jnp.float32).at[0, :N_IN].set(x[0])
    amp = jnp.asarray(binary_amp, jnp.float32).reshape(1)
    out = _generator_pallas(amp, x_pad, w_pad, b_pad, tb=8)
    return out[0, :N_OUT].reshape(H, W, C)


@functools.partial(jax.jit, static_argnames=("tb",))
def generator_forward_batched(ipt_batch, binary_amp, w_pad, b_pad, tb=256):
    """Batched entry point: ipt_batch (B, 25) -> (B, 20, 20, 3).
    tb=256 fills the v6e/v7x MXU M dim; use tb=128 on v5e."""
    b = ipt_batch.shape[0]
    x = ipt_batch.reshape(b, N_IN).astype(jnp.float32)
    bp = tb * pl.cdiv(b, tb)
    x_pad = jnp.zeros((bp, N_IN_PAD), jnp.float32).at[:b, :N_IN].set(x)
    amp = jnp.asarray(binary_amp, jnp.float32).reshape(1)
    out = _generator_pallas(amp, x_pad, w_pad, b_pad, tb)
    return out[:b, :N_OUT].reshape(b, H, W, C)


if __name__ == "__main__":
    key = jax.random.PRNGKey(0)
    pkey, xkey, bkey = jax.random.split(key, 3)
    params = init_params(pkey)
    w_pad, b_pad = fuse_params(params)
    w1_t, b1, w2_t, b2 = params

    # --- single-sample path (exact module semantics) ---
    ipt = jax.random.normal(xkey, (5, 5), jnp.float32)   # 25 elements, as in .view(-1)
    binary_amp = jnp.float32(0.5)                         # traced device scalar, not a Python float

    out = generator_forward(ipt, binary_amp, w_pad, b_pad)
    out = jax.block_until_ready(out)

    ref = jnp.tanh(
        ((ipt.reshape(-1) @ w1_t + b1) @ w2_t + b2) * binary_amp
    ).reshape(H, W, C)
    assert out.shape == (H, W, C)
    assert jnp.allclose(out, ref, atol=1e-4), "single-sample mismatch vs reference"

    # --- batched path (small B for the test; tb=256 default for production) ---
    bsz = 4
    xb = jax.random.normal(bkey, (bsz, N_IN), jnp.float32)
    outb = jax.block_until_ready(
        generator_forward_batched(xb, binary_amp, w_pad, b_pad, tb=8))
    refb = jnp.tanh(((xb @ w1_t + b1) @ w2_t + b2) * binary_amp).reshape(bsz, H, W, C)
    assert outb.shape == (bsz, H, W, C)
    assert jnp.allclose(outb, refb, atol=1e-4), "batched mismatch vs reference"

    print("KERNEL_OK")
</pallas_src>

<mosaic_0001>
module attributes {stable_mosaic.version = 11 : i64} {
  func.func @generator_kernel(%arg0: i32, %arg1: memref<1xf32, #tpu.memory_space<smem>>, %arg2: memref<8x32xf32, #tpu.memory_space<vmem>>, %arg3: memref<32x1280xf32, #tpu.memory_space<vmem>>, %arg4: memref<1x1280xf32, #tpu.memory_space<vmem>>, %arg5: memref<8x1280xf32, #tpu.memory_space<vmem>>) attributes {dimension_semantics = [#tpu.dimension_semantics<parallel>], iteration_bounds = array<i64: 1>, scalar_prefetch = 1 : i64, scratch_operands = 0 : i64, tpu.core_type = #tpu.core_type<tc>, window_params = [{transform_indices = @transform_0, window_bounds = array<i64: 8, 32>}, {pipeline_mode = #tpu.pipeline_mode<synchronous>, transform_indices = @transform_1, window_bounds = array<i64: 32, 1280>}, {pipeline_mode = #tpu.pipeline_mode<synchronous>, transform_indices = @transform_2, window_bounds = array<i64: 1, 1280>}, {transform_indices = @transform_3, window_bounds = array<i64: 8, 1280>}]} {
    %c0 = arith.constant 0 : index
    %c0_0 = arith.constant 0 : index
    %0 = vector.load %arg2[%c0, %c0_0] : memref<8x32xf32, #tpu.memory_space<vmem>>, vector<8x32xf32>
    %c0_1 = arith.constant 0 : index
    %c0_2 = arith.constant 0 : index
    %1 = vector.load %arg3[%c0_1, %c0_2] : memref<32x1280xf32, #tpu.memory_space<vmem>>, vector<32x1280xf32>
    %cst = arith.constant dense<0.000000e+00> : vector<8x1280xf32>
    %2 = tpu.matmul %0, %1, %cst {dimension_numbers = #tpu.dot_dimension_numbers<[1], [0], [0], [1], [0, 0, 1, 1], [], []>} : vector<8x32xf32>, vector<32x1280xf32>, vector<8x1280xf32> -> vector<8x1280xf32>
    %c0_3 = arith.constant 0 : index
    %c0_4 = arith.constant 0 : index
    %3 = vector.load %arg4[%c0_3, %c0_4] : memref<1x1280xf32, #tpu.memory_space<vmem>>, vector<1x1280xf32>
    %4 = vector.broadcast %3 : vector<1x1280xf32> to vector<8x1280xf32>
    %5 = arith.addf %2, %4 : vector<8x1280xf32>
    %c0_5 = arith.constant 0 : index
    %6 = memref.load %arg1[%c0_5] : memref<1xf32, #tpu.memory_space<smem>>
    %7 = vector.broadcast %6 : f32 to vector<8x1280xf32>
    %8 = arith.mulf %5, %7 : vector<8x1280xf32>
    %9 = math.tanh %8 : vector<8x1280xf32>
    %c0_6 = arith.constant 0 : index
    %c0_7 = arith.constant 0 : index
    %10 = vector.load %arg5[%c0_6, %c0_7] : memref<8x1280xf32, #tpu.memory_space<vmem>>, vector<8x1280xf32>
    tpu.vector_store %arg5[%c0_6, %c0_7], %9 {strides = array<i32>} : memref<8x1280xf32, #tpu.memory_space<vmem>>, vector<8x1280xf32>,
    return
  }
  func.func @transform_0(%arg0: i32, %arg1: memref<1xf32, #tpu.memory_space<smem>>) -> (i32, i32) {
    %c0_i32 = arith.constant 0 : i32
    %c0_i32_0 = arith.constant 0 : i32
    return %arg0, %c0_i32 : i32, i32
  }
  func.func @transform_1(%arg0: i32, %arg1: memref<1xf32, #tpu.memory_space<smem>>) -> (i32, i32) {
    %c0_i32 = arith.constant 0 : i32
    %c0_i32_0 = arith.constant 0 : i32
    %c0_i32_1 = arith.constant 0 : i32
    return %c0_i32, %c0_i32_0 : i32, i32
  }
  func.func @transform_2(%arg0: i32, %arg1: memref<1xf32, #tpu.memory_space<smem>>) -> (i32, i32) {
    %c0_i32 = arith.constant 0 : i32
    %c0_i32_0 = arith.constant 0 : i32
    %c0_i32_1 = arith.constant 0 : i32
    return %c0_i32, %c0_i32_0 : i32, i32
  }
  func.func @transform_3(%arg0: i32, %arg1: memref<1xf32, #tpu.memory_space<smem>>) -> (i32, i32) {
    %c0_i32 = arith.constant 0 : i32
    %c0_i32_0 = arith.constant 0 : i32
    return %arg0, %c0_i32 : i32, i32
  }
}

</mosaic_0001>

<bundles_post_ra>
// kernel: squeeze.1
= control target key start
LH: loop header
LB: loop body
LE: loop exit
PB: predicated region body
PF: predicated region fallthrough
CT: control target
= control target key end

     0   :  { %s1578_s10 = smov 127   ;;  %s1579_s11 = smov 125   ;;  %vm3_vm0 = vcmask 23552   ;;  %vm1079_vm1 = vcmask 1031168   ;;  %vm1093_vm2 = vcmask 1039360   ;;  %vm1083_vm3 = vcmask 15360   ;;  %s2963_s0 = inlined_call_operand.vmem [shape: f32[1200], index: 0, kind: input, shape index: {}]   ;;  %s2964_s1 = inlined_call_operand.vmem [shape: f32[20,20,3], index: 1, kind: output, shape index: {}]  }
   0x1   :  { %v1108_v0 = vld [vmem:[%s2963_s0 + $0x7] ss:$-3 sm:$0x7]   ;;  %v23_v1 = vld.sshfl [vmem:[%s2963_s0] sm:$0xff pattern:$0x33333690]  }
   0x2   :  { %9 = vrot.lane.b32.xlu0 %v1108_v0, %s1578_s10  ;;  %24 = vrot.lane.b32.xlu1 %v23_v1, %s1579_s11  ;;  %v1724_v2 = vld.sshfl [vmem:[%s2963_s0 + $0x2] sm:$0xff pattern:$0x33333360]   ;;  %v1115_v3 = vld [vmem:[%s2963_s0 + $0x7] ss:$-3 sm:$0x7]  }
   0x3   :  { %s1580_s16 = smov 126   ;;  %s1581_s17 = smov 124   ;;  %v1123_v4 = vld [vmem:[%s2963_s0 + $0x7] ss:$-3 sm:$0x7]   ;;  %vm1097_vm4 = vcmask 7168  }
   0x4   :  { %s1582_s18 = smov 123   ;;  %s1583_s19 = smov 122   ;;  %v1737_v5 = vld.sshfl [vmem:[%s2963_s0 + $0x2] sm:$0xff pattern:$0x66666603]   ;;  %vm1086_vm5 = vcmask 23568  }
   0x5   :  { %s1584_s24 = smov 121   ;;  %s1585_s25 = smov 120   ;;  %v1131_v6 = vld [vmem:[%s2963_s0 + $0x7] ss:$-3 sm:$0x7]   ;;  %vm1102_vm6 = vcmask 23560  }
   0x6   :  { %16 = vrot.lane.b32.xlu0 %v1724_v2, %s1580_s16  ;;  %33 = vrot.lane.b32.xlu1 %v1115_v3, %s1581_s17  ;;  %s1586_s28 = smov 119   ;;  %s1587_s29 = smov 118   ;;  %v1139_v7 = vld [vmem:[%s2963_s0 + $0x7] ss:$-3 sm:$0x7]  }
   0x7   :  { %s1588_s30 = smov 117   ;;  %s1589_s2 = smov 116   ;;  %v1147_v8 = vld [vmem:[%s2963_s0 + $0x7] ss:$-3 sm:$0x7]  }
   0x8   :  { %s1590_s5 = smov 115   ;;  %s1591_s6 = smov 114   ;;  %v1155_v9 = vld [vmem:[%s2963_s0 + $0x7] ss:$-3 sm:$0x7]  }
   0x9   :  { %s1592_s9 = smov 113   ;;  %s1593_s10 = smov 112   ;;  %v1158_v10 = vld [vmem:[%s2963_s0 + $0x8] ss:$-3 sm:$0x7]  }
   0xa   :  { %42 = vrot.lane.b32.xlu0 %v1724_v2, %s1582_s18  ;;  %50 = vrot.lane.b32.xlu1 %v23_v1, %s1583_s19  ;;  %s1594_s11 = smov 111   ;;  %s1595_s12 = smov 110   ;;  %v1163_v11 = vld [vmem:[%s2963_s0 + $0x7] ss:$-3 sm:$0x7]  }
   0xb   :  { %s1596_s17 = smov 109   ;;  %s1597_s18 = smov 108   ;;  %v1166_v12 = vld [vmem:[%s2963_s0 + $0x8] ss:$-3 sm:$0x7]  }
   0xc   :  { %s1598_s21 = smov 107   ;;  %s1599_s22 = smov 106   ;;  %v205_v13 = vld.sshfl [vmem:[%s2963_s0] sm:$0xff pattern:$0x66666903]  }
   0xd   :  { %s1600_s27 = smov 105   ;;  %v1171_v14 = vld [vmem:[%s2963_s0 + $0x7] ss:$-3 sm:$0x7]   ;;  %s1602_s4 = smov 103  }
   0xe   :  { %59 = vrot.lane.b32.xlu0 %v1123_v4, %s1584_s24  ;;  %68 = vrot.lane.b32.xlu1 %v1737_v5, %s1585_s25  ;;  %v1174_v15 = vld [vmem:[%s2963_s0 + $0x8] ss:$-3 sm:$0x7]   ;;  %v1179_v16 = vld [vmem:[%s2963_s0 + $0x7] ss:$-3 sm:$0x7]  }
   0xf   :  { %s1604_s8 = smov 101   ;;  %v1182_v17 = vld [vmem:[%s2963_s0 + $0x8] ss:$-3 sm:$0x7]   ;;  %s1607_s13 = smov 98  }
  0x10   :  { %v1187_v18 = vld [vmem:[%s2963_s0 + $0x7] ss:$-3 sm:$0x7]   ;;  %v1190_v19 = vld [vmem:[%s2963_s0 + $0x8] ss:$-3 sm:$0x7]  }
  0x11   :  { %s1609_s19 = smov 96   ;;  %v1195_v20 = vld [vmem:[%s2963_s0 + $0x7] ss:$-3 sm:$0x7]   ;;  %s1611_s23 = smov 94  }
  0x12   :  { %76 = vrot.lane.b32.xlu0 %v23_v1, %s1586_s28  ;;  %85 = vrot.lane.b32.xlu1 %v1131_v6, %s1587_s29  ;;  %s1601_s28 = smov 104   ;;  %v1198_v21 = vld [vmem:[%s2963_s0 + $0x8] ss:$-3 sm:$0x7]   ;;  %s1613_s29 = smov 92  }
  0x13   :  { %v309_v22 = vld.sshfl [vmem:[%s2963_s0] sm:$0xff pattern:$0x99999036]   ;;  %v1203_v23 = vld [vmem:[%s2963_s0 + $0x7] ss:$-3 sm:$0x7]  }
  0x14   :  { %v1206_v24 = vld [vmem:[%s2963_s0 + $0x8] ss:$-3 sm:$0x7]   ;;  %v1803_v25 = vld.sshfl [vmem:[%s2963_s0 + $0x1] sm:$0xff pattern:$0x33333360]  }
  0x15   :  { %v1214_v26 = vld [vmem:[%s2963_s0 + $0x8] ss:$-3 sm:$0x7]   ;;  %s1619_s14 = smov 86   ;;  %s1623_s20 = smov 82  }
  0x16   :  { %94 = vrot.lane.b32.xlu0 %v1737_v5, %s1588_s30  ;;  %102 = vrot.lane.b32.xlu1 %v23_v1, %s1589_s2  ;;  %v1222_v27 = vld [vmem:[%s2963_s0 + $0x8] ss:$-3 sm:$0x7]   ;;  %v1231_v29 = vld [vmem:[%s2963_s0 + $0x6] ss:$-3 sm:$0x7]  }
  0x17   :  { %v1229_v28 = vld [vmem:[%s2963_s0 + $0x8] ss:$-3 sm:$0x7]   ;;  %s1624_s25 = smov 81   ;;  %s1625_s26 = smov 80  }
  0x18   :  { %v1237_v30 = vld [vmem:[%s2963_s0 + $0x8] ss:$-3 sm:$0x7]   ;;  %s1627_s30 = smov 78   ;;  %s1629_s7 = smov 76  }
  0x19   :  { %v1239_v31 = vld [vmem:[%s2963_s0 + $0x6] ss:$-3 sm:$0x7]   ;;  %v1242_v32 = vld.sshfl [vmem:[%s2963_s0 + $0x1] sm:$0xff pattern:$0x66666603]  }
  0x1a   :  { %111 = vrot.lane.b32.xlu0 %v1139_v7, %s1590_s5  ;;  %120 = vrot.lane.b32.xlu1 %v1737_v5, %s1591_s6  ;;  %s1603_s5 = smov 102   ;;  %s1615_s6 = smov 90   ;;  %v1245_v33 = vld [vmem:[%s2963_s0 + $0x8] ss:$-3 sm:$0x7]  }
  0x1b   :  { %v1247_v34 = vld [vmem:[%s2963_s0 + $0x6] ss:$-3 sm:$0x7]   ;;  %v1253_v35 = vld [vmem:[%s2963_s0 + $0x8] ss:$-3 sm:$0x7]  }
  0x1c   :  { %s1632_s16 = smov 73   ;;  %v1256_v36 = vld [vmem:[%s2963_s0 + $0x6] ss:$-3 sm:$0x7]   ;;  %s1636_s3 = smov 69  }
  0x1d   :  { %v1262_v37 = vld [vmem:[%s2963_s0 + $0x8] ss:$-3 sm:$0x7]   ;;  %v1265_v38 = vld [vmem:[%s2963_s0 + $0x6] ss:$-3 sm:$0x7]  }
  0x1e   :  { %128 = vrot.lane.b32.xlu0 %v23_v1, %s1592_s9  ;;  %137 = vrot.lane.b32.xlu1 %v1147_v8, %s1593_s10  ;;  %s1605_s9 = smov 100   ;;  %s1617_s10 = smov 88   ;;  %v1270_v41 = vld [vmem:[%s2963_s0 + $0x8] ss:$-3 sm:$0x7]  }
  0x1f   :  { %s1638_s15 = smov 67   ;;  %v1273_v44 = vld [vmem:[%s2963_s0 + $0x6] ss:$-3 sm:$0x7]   ;;  %s1649_s24 = smov 56  }
  0x20   :  { %v1275_v45 = vld [vmem:[%s2963_s0 + $0x7] ss:$-3 sm:$0x7]   ;;  %v1278_v48 = vld [vmem:[%s2963_s0 + $0x8] ss:$-3 sm:$0x7]  }
  0x21   :  { %v1281_v49 = vld [vmem:[%s2963_s0 + $0x6] ss:$-3 sm:$0x7]   ;;  %v1283_v52 = vld [vmem:[%s2963_s0 + $0x7] ss:$-3 sm:$0x7]  }
  0x22   :  { %146 = vrot.lane.b32.xlu0 %v1737_v5, %s1594_s11  ;;  %154 = vrot.lane.b32.xlu1 %v23_v1, %s1595_s12  ;;  %s1606_s12 = smov 99   ;;  %v1289_v55 = vld [vmem:[%s2963_s0 + $0x6] ss:$-3 sm:$0x7]   ;;  %s1646_s11 = smov 59  }
  0x23   :  { %v1291_v56 = vld [vmem:[%s2963_s0 + $0x7] ss:$-3 sm:$0x7]   ;;  %v1297_v59 = vld [vmem:[%s2963_s0 + $0x6] ss:$-3 sm:$0x7]  }
  0x24   :  { %v1300_v62 = vld [vmem:[%s2963_s0 + $0x7] ss:$-3 sm:$0x7]   ;;  %v1315_v7 = vld [vmem:[%s2963_s0 + $0x6] ss:$-3 sm:$0x7]  }
  0x25   :  { %v1309_v3 = vld [vmem:[%s2963_s0 + $0x7] ss:$-3 sm:$0x7]   ;;  %s1678_s2 = smov 29  }
  0x26   :  { %163 = vrot.lane.b32.xlu0 %v1155_v9, %s1596_s17  ;;  %172 = vrot.lane.b32.xlu1 %v1158_v10, %s1597_s18  ;;  %s1608_s18 = smov 97   ;;  %s1620_s17 = smov 85   ;;  %v1318_v10 = vld [vmem:[%s2963_s0 + $0x7] ss:$-3 sm:$0x7]  }
  0x2a   :  { %180 = vrot.lane.b32.xlu0 %v23_v1, %s1598_s21  ;;  %189 = vrot.lane.b32.xlu1 %v1163_v11, %s1599_s22  ;;  %s1610_s22 = smov 95   ;;  %s1635_s21 = smov 70   ;;  %v1306_v1 = vld [vmem:[%s2963_s0 + $0x6] ss:$-3 sm:$0x7]  }
  0x2e   :  { %198 = vrot.lane.b32.xlu0 %v1166_v12, %s1600_s27  ;;  %206 = vrot.lane.b32.xlu1 %v205_v13, %s1601_s28  ;;  %s1612_s28 = smov 93   ;;  %s1645_s27 = smov 60  }
  0x32   :  { %215 = vrot.lane.b32.xlu0 %v1171_v14, %s1602_s4  ;;  %224 = vrot.lane.b32.xlu1 %v1174_v15, %s1603_s5  ;;  %s1614_s5 = smov 91   ;;  %s1637_s4 = smov 68   ;;  %v1327_v14 = vld [vmem:[%s2963_s0 + $0x7] ss:$-3 sm:$0x7]  }
  0x36   :  { %232 = vrot.lane.b32.xlu0 %v205_v13, %s1604_s8  ;;  %241 = vrot.lane.b32.xlu1 %v1179_v16, %s1605_s9  ;;  %s1616_s9 = smov 89   ;;  %s1665_s8 = smov 40  }
  0x3a   :  { %250 = vrot.lane.b32.xlu0 %v1182_v17, %s1606_s12  ;;  %258 = vrot.lane.b32.xlu1 %v205_v13, %s1607_s13  ;;  %s1618_s13 = smov 87   ;;  %s1630_s12 = smov 75   ;;  %v721_v17 = vld.sshfl [vmem:[%s2963_s0] sm:$0xff pattern:$0x33333360]  }
  0x3e   :  { %267 = vrot.lane.b32.xlu0 %v1187_v18, %s1608_s18  ;;  %276 = vrot.lane.b32.xlu1 %v1190_v19, %s1609_s19  ;;  %s1621_s18 = smov 84   ;;  %s1622_s19 = smov 83  }
  0x42   :  { %284 = vrot.lane.b32.xlu0 %v205_v13, %s1610_s22  ;;  %293 = vrot.lane.b32.xlu1 %v1195_v20, %s1611_s23  ;;  %s1648_s23 = smov 57   ;;  %v1324_v13 = vld [vmem:[%s2963_s0 + $0x6] ss:$-3 sm:$0x7]   ;;  %s1677_s22 = smov 1  }
  0x43   :  { %v1335_v20 = vld [vmem:[%s2963_s0 + $0x7] ss:$-3 sm:$0x7]  }
  0x46   :  { %302 = vrot.lane.b32.xlu0 %v1198_v21, %s1612_s28  ;;  %310 = vrot.lane.b32.xlu1 %v309_v22, %s1613_s29  ;;  %s1626_s29 = smov 79  }
  0x4a   :  { %319 = vrot.lane.b32.xlu0 %v1203_v23, %s1614_s5  ;;  %328 = vrot.lane.b32.xlu1 %v1206_v24, %s1615_s6  ;;  %s1628_s6 = smov 77   ;;  %v1343_v23 = vld [vmem:[%s2963_s0 + $0x7] ss:$-3 sm:$0x7]   ;;  %s1684_s5 = smov 23  }
  0x4e   :  { %336 = vrot.lane.b32.xlu0 %v309_v22, %s1616_s9  ;;  %345 = vrot.lane.b32.xlu1 %v1803_v25, %s1617_s10  ;;  %s1690_s10 = smov 17  }
  0x52   :  { %354 = vrot.lane.b32.xlu0 %v1214_v26, %s1618_s13  ;;  %362 = vrot.lane.b32.xlu1 %v309_v22, %s1619_s14  ;;  %s1631_s13 = smov 74   ;;  %s1642_s14 = smov 63  }
  0x56   :  { %371 = vrot.lane.b32.xlu0 %v1803_v25, %s1620_s17  ;;  %380 = vrot.lane.b32.xlu1 %v1222_v27, %s1621_s18  ;;  %s1633_s17 = smov 72   ;;  %s1667_s18 = smov 38  }
  0x5a   :  { %386 = vrot.lane.b32.xlu0 %v309_v22, %s1622_s19  ;;  %395 = vrot.lane.b32.xlu1 %v1803_v25, %s1623_s20  ;;  %s1634_s20 = smov 71  }
  0x5e   :  { %404 = vrot.lane.b32.xlu0 %v1229_v28, %s1624_s25  ;;  %411 = vrot.lane.b32.xlu1 %v1231_v29, %s1625_s26  ;;  %s1644_s26 = smov 61   ;;  %s1663_s25 = smov 42   ;;  %v1351_v29 = vld [vmem:[%s2963_s0 + $0x7] ss:$-3 sm:$0x7]  }
  0x62   :  { %420 = vrot.lane.b32.xlu0 %v1803_v25, %s1626_s29  ;;  %429 = vrot.lane.b32.xlu1 %v1237_v30, %s1627_s30  ;;  %s1640_s29 = smov 65   ;;  %s1641_s30 = smov 64  }
  0x66   :  { %436 = vrot.lane.b32.xlu0 %v1239_v31, %s1628_s6  ;;  %445 = vrot.lane.b32.xlu1 %v1242_v32, %s1629_s7  ;;  %s1650_s6 = smov 55   ;;  %s1651_s7 = smov 54  }
  0x6a   :  { %454 = vrot.lane.b32.xlu0 %v1245_v33, %s1630_s12  ;;  %461 = vrot.lane.b32.xlu1 %v1247_v34, %s1631_s13  ;;  %s1647_s12 = smov 58   ;;  %s1661_s13 = smov 44  }
  0x6e   :  { %470 = vrot.lane.b32.xlu0 %v1242_v32, %s1632_s16  ;;  %479 = vrot.lane.b32.xlu1 %v1253_v35, %s1633_s17  ;;  %s1639_s16 = smov 66   ;;  %s1666_s17 = smov 39   ;;  %v2207_v35 = vld.sshfl [vmem:[%s2963_s0] sm:$0xff pattern:$0x66666603]  }
  0x72   :  { %488 = vrot.lane.b32.xlu0 %v1256_v36, %s1634_s20  ;;  %497 = vrot.lane.b32.xlu1 %v1242_v32, %s1635_s21  ;;  %s1652_s20 = smov 53   ;;  %s1653_s21 = smov 52  }
  0x74   :  { %v10_v39 = vpop.permute.xlu0 %9   ;;  %v25_v40 = vpop.permute.xlu1 %24  }
  0x75   :  { %1109 = vst.msk [vmem:[%s2964_s1 + $0x163] ss:$-152 sm:$0x7] %vm3_vm0, %v10_v39   ;;  %1113 = vst.msk [vmem:[%s2964_s1 + $0x1] ss:$460 sm:$0x3] %vm3_vm0, %v25_v40  }
  0x76   :  { %1114 = vst.msk [vmem:[%s2964_s1 + $0x261] ss:$-152 sm:$0xc] %vm3_vm0, %v25_v40   ;;  %506 = vrot.lane.b32.xlu0 %v1262_v37, %s1636_s3  ;;  %515 = vrot.lane.b32.xlu1 %v1265_v38, %s1637_s4  ;;  %s1654_s3 = smov 51   ;;  %s1655_s4 = smov 50  }
  0x77   :  { %v1367_v38 = vld [vmem:[%s2963_s0 + $0x7] ss:$-3 sm:$0x7]   ;;  %v1441_v39 = vld [vmem:[%s2963_s0 + $0x6] ss:$-3 sm:$0x7]  }
  0x78   :  { %v17_v42 = vpop.permute.xlu0 %16   ;;  %v34_v43 = vpop.permute.xlu1 %33  }
  0x79   :  { %1111 = vst.msk [vmem:[%s2964_s1 + $0x66] ss:$308 sm:$0x3] %vm3_vm0, %v17_v42   ;;  %1112 = vst.msk [vmem:[%s2964_s1 + $0xfc] sm:$0x4] %vm3_vm0, %v17_v42  }
  0x7a   :  { %1116 = vst.msk [vmem:[%s2964_s1 + $0x168] ss:$-156 sm:$0x3] %vm3_vm0, %v34_v43   ;;  %1117 = vst.msk [vmem:[%s2964_s1 + $0x32] sm:$0x4] %vm3_vm0, %v34_v43   ;;  %522 = vrot.lane.b32.xlu0 %v1242_v32, %s1638_s15  ;;  %531 = vrot.lane.b32.xlu1 %v1270_v41, %s1639_s16  ;;  %s1643_s15 = smov 62  }
  0x7b   :  { %s1657_s16 = smov 48   ;;  %v1359_v32 = vld [vmem:[%s2963_s0 + $0x7] ss:$-3 sm:$0x7]  }
  0x7c   :  { %v43_v46 = vpop.permute.xlu0 %42   ;;  %v51_v47 = vpop.permute.xlu1 %50   ;;  %v1442_v42 = vld [vmem:[%s2963_s0 + $0x7] ss:$-3 sm:$0x7]  }
  0x7d   :  { %1119 = vst.msk [vmem:[%s2964_s1 + $0x67] ss:$308 sm:$0x3] %vm3_vm0, %v43_v46   ;;  %1120 = vst.msk [vmem:[%s2964_s1 + $0xfd] sm:$0x4] %vm3_vm0, %v43_v46   ;;  %v1080_v43 = vsel %vm1079_vm1, %v1442_v42, %v1441_v39 }
  0x7e   :  { %1121 = vst.msk [vmem:[%s2964_s1 + $0x2] ss:$460 sm:$0x3] %vm3_vm0, %v51_v47   ;;  %1122 = vst.msk [vmem:[%s2964_s1 + $0x262] ss:$-152 sm:$0xc] %vm3_vm0, %v51_v47   ;;  %540 = vrot.lane.b32.xlu0 %v1273_v44, %s1640_s29  ;;  %547 = vrot.lane.b32.xlu1 %v1275_v45, %s1641_s30 }
  0x7f   :  { %s1658_s29 = smov 47   ;;  %s1659_s30 = smov 46   ;;  %v1375_v46 = vld [vmem:[%s2963_s0 + $0x7] ss:$-3 sm:$0x7]  }
  0x80   :  { %v60_v50 = vpop.permute.xlu0 %59   ;;  %v69_v51 = vpop.permute.xlu1 %68  }
  0x81   :  { %1124 = vst.msk [vmem:[%s2964_s1 + $0x169] ss:$-156 sm:$0x3] %vm3_vm0, %v60_v50   ;;  %1125 = vst.msk [vmem:[%s2964_s1 + $0x33] sm:$0x4] %vm3_vm0, %v60_v50  }
  0x82   :  { %1127 = vst.msk [vmem:[%s2964_s1 + $0x100] ss:$-152 sm:$0x3] %vm3_vm0, %v69_v51   ;;  %1128 = vst.msk [vmem:[%s2964_s1 + $0x19a] sm:$0x4] %vm3_vm0, %v69_v51   ;;  %556 = vrot.lane.b32.xlu0 %v1278_v48, %s1642_s14  ;;  %565 = vrot.lane.b32.xlu1 %v1281_v49, %s1643_s15  ;;  %s1656_s15 = smov 49  }
  0x83   :  { %v1386_v51 = vld [vmem:[%s2963_s0 + $0x8] ss:$-3 sm:$0x7]   ;;  %s1697_s14 = smov 10  }
  0x84   :  { %v77_v53 = vpop.permute.xlu0 %76   ;;  %v86_v54 = vpop.permute.xlu1 %85  }
  0x85   :  { %1129 = vst.msk [vmem:[%s2964_s1 + $0x3] ss:$460 sm:$0x3] %vm3_vm0, %v77_v53   ;;  %1130 = vst.msk [vmem:[%s2964_s1 + $0x263] ss:$-152 sm:$0xc] %vm3_vm0, %v77_v53  }
  0x86   :  { %1132 = vst.msk [vmem:[%s2964_s1 + $0x16a] ss:$-156 sm:$0x3] %vm3_vm0, %v86_v54   ;;  %1133 = vst.msk [vmem:[%s2964_s1 + $0x34] sm:$0x4] %vm3_vm0, %v86_v54   ;;  %572 = vrot.lane.b32.xlu0 %v1283_v52, %s1644_s26  ;;  %581 = vrot.lane.b32.xlu1 %v1724_v2, %s1645_s27 }
  0x87   :  { %v1390_v54 = vld [vmem:[%s2963_s0 + $0x7] ss:$-3 sm:$0x7]  }
  0x88   :  { %v95_v57 = vpop.permute.xlu0 %94   ;;  %v103_v58 = vpop.permute.xlu1 %102  }
  0x89   :  { %1135 = vst.msk [vmem:[%s2964_s1 + $0x101] ss:$-152 sm:$0x3] %vm3_vm0, %v95_v57   ;;  %1136 = vst.msk [vmem:[%s2964_s1 + $0x19b] sm:$0x4] %vm3_vm0, %v95_v57  }
  0x8a   :  { %1137 = vst.msk [vmem:[%s2964_s1 + $0x4] ss:$460 sm:$0x3] %vm3_vm0, %v103_v58   ;;  %1138 = vst.msk [vmem:[%s2964_s1 + $0x270] ss:$-156 sm:$0xc] %vm3_vm0, %v103_v58   ;;  %590 = vrot.lane.b32.xlu0 %v1289_v55, %s1646_s11  ;;  %597 = vrot.lane.b32.xlu1 %v1291_v56, %s1647_s12 }
  0x8b   :  { %s1660_s12 = smov 45   ;;  %s1674_s11 = smov 31   ;;  %v1393_v57 = vld [vmem:[%s2963_s0 + $0x8] ss:$-3 sm:$0x7]  }
  0x8c   :  { %v112_v60 = vpop.permute.xlu0 %111   ;;  %v121_v61 = vpop.permute.xlu1 %120  }
  0x8d   :  { %1140 = vst.msk [vmem:[%s2964_s1 + $0x16b] ss:$-156 sm:$0x3] %vm3_vm0, %v112_v60   ;;  %1141 = vst.msk [vmem:[%s2964_s1 + $0x35] sm:$0x4] %vm3_vm0, %v112_v60  }
  0x8e   :  { %1143 = vst.msk [vmem:[%s2964_s1 + $0x102] ss:$-152 sm:$0x3] %vm3_vm0, %v121_v61   ;;  %1144 = vst.msk [vmem:[%s2964_s1 + $0x19c] sm:$0x4] %vm3_vm0, %v121_v61   ;;  %606 = vrot.lane.b32.xlu0 %v1724_v2, %s1648_s23  ;;  %615 = vrot.lane.b32.xlu1 %v1297_v59, %s1649_s24  ;;  %s1662_s24 = smov 43  }
  0x8f   :  { %v1397_v60 = vld [vmem:[%s2963_s0 + $0x7] ss:$-3 sm:$0x7]   ;;  %v1400_v61 = vld [vmem:[%s2963_s0 + $0x8] ss:$-3 sm:$0x7]  }
  0x90   :  { %v129_v63 = vpop.permute.xlu0 %128   ;;  %v138_v0 = vpop.permute.xlu1 %137   ;;  %s1693_s23 = smov 14  }
  0x91   :  { %1145 = vst.msk [vmem:[%s2964_s1 + $0x5] ss:$460 sm:$0x3] %vm3_vm0, %v129_v63   ;;  %1146 = vst.msk [vmem:[%s2964_s1 + $0x271] ss:$-156 sm:$0xc] %vm3_vm0, %v129_v63  }
  0x92   :  { %1148 = vst.msk [vmem:[%s2964_s1 + $0x16c] ss:$-156 sm:$0x3] %vm3_vm0, %v138_v0   ;;  %1149 = vst.msk [vmem:[%s2964_s1 + $0x36] sm:$0x4] %vm3_vm0, %v138_v0   ;;  %624 = vrot.lane.b32.xlu0 %v1300_v62, %s1650_s6  ;;  %633 = vrot.lane.b32.xlu1 %v1724_v2, %s1651_s7  ;;  %s1664_s7 = smov 41  }
  0x93   :  { %s1685_s6 = smov 22  }
  0x94   :  { %v147_v4 = vpop.permute.xlu0 %146   ;;  %v155_v6 = vpop.permute.xlu1 %154  }
  0x95   :  { %1151 = vst.msk [vmem:[%s2964_s1 + $0x103] ss:$-152 sm:$0x3] %vm3_vm0, %v147_v4   ;;  %1152 = vst.msk [vmem:[%s2964_s1 + $0x19d] sm:$0x4] %vm3_vm0, %v147_v4  }
  0x96   :  { %1153 = vst.msk [vmem:[%s2964_s1 + $0x6] ss:$460 sm:$0x3] %vm3_vm0, %v155_v6   ;;  %1154 = vst.msk [vmem:[%s2964_s1 + $0x272] ss:$-156 sm:$0xc] %vm3_vm0, %v155_v6   ;;  %642 = vrot.lane.b32.xlu0 %v1306_v1, %s1652_s20  ;;  %651 = vrot.lane.b32.xlu1 %v1309_v3, %s1653_s21 }
  0x97   :  { %s1676_s21 = smov 2   ;;  %v1407_v3 = vld [vmem:[%s2963_s0 + $0x8] ss:$-3 sm:$0x7]  }
  0x98   :  { %v164_v8 = vpop.permute.xlu0 %163   ;;  %v173_v9 = vpop.permute.xlu1 %172  }
  0x99   :  { %1156 = vst.msk [vmem:[%s2964_s1 + $0x16d] ss:$-156 sm:$0x3] %vm3_vm0, %v164_v8   ;;  %1157 = vst.msk [vmem:[%s2964_s1 + $0x37] sm:$0x4] %vm3_vm0, %v164_v8  }
  0x9a   :  { %1159 = vst.msk [vmem:[%s2964_s1 + $0x1a0] ss:$-152 sm:$0x3] %vm3_vm0, %v173_v9   ;;  %1160 = vst.msk [vmem:[%s2964_s1 + $0x6a] sm:$0x4] %vm3_vm0, %v173_v9   ;;  %660 = vrot.lane.b32.xlu0 %v1724_v2, %s1654_s3  ;;  %669 = vrot.lane.b32.xlu1 %v1315_v7, %s1655_s4  ;;  %v1094_v2 = vsel %vm1093_vm2, %v1724_v2, %v1803_v25  ;;  %s1679_s3 = smov 28  }
  0x9b   :  { %v1414_v7 = vld [vmem:[%s2963_s0 + $0x8] ss:$-3 sm:$0x7]   ;;  %s1695_s4 = smov 12  }
  0x9c   :  { %v181_v11 = vpop.permute.xlu0 %180   ;;  %v190_v12 = vpop.permute.xlu1 %189  }
  0x9d   :  { %1161 = vst.msk [vmem:[%s2964_s1 + $0x7] ss:$460 sm:$0x3] %vm3_vm0, %v181_v11   ;;  %1162 = vst.msk [vmem:[%s2964_s1 + $0x273] ss:$-156 sm:$0xc] %vm3_vm0, %v181_v11  }
  0x9e   :  { %1164 = vst.msk [vmem:[%s2964_s1 + $0x16e] ss:$-156 sm:$0x3] %vm3_vm0, %v190_v12   ;;  %1165 = vst.msk [vmem:[%s2964_s1 + $0x38] sm:$0x4] %vm3_vm0, %v190_v12   ;;  %678 = vrot.lane.b32.xlu0 %v1318_v10, %s1656_s15  ;;  %687 = vrot.lane.b32.xlu1 %v1737_v5, %s1657_s16 }
  0x9f   :  { %v1422_v12 = vld [vmem:[%s2963_s0 + $0x8] ss:$-3 sm:$0x7]  }
  0xa0   :  { %v199_v15 = vpop.permute.xlu0 %198   ;;  %v207_v16 = vpop.permute.xlu1 %206  }
  0xa1   :  { %1167 = vst.msk [vmem:[%s2964_s1 + $0x1a1] ss:$-152 sm:$0x3] %vm3_vm0, %v199_v15   ;;  %1168 = vst.msk [vmem:[%s2964_s1 + $0x6b] sm:$0x4] %vm3_vm0, %v199_v15  }
  0xa2   :  { %1169 = vst.msk [vmem:[%s2964_s1 + $0xa0] ss:$-152 sm:$0x3] %vm3_vm0, %v207_v16   ;;  %1170 = vst.msk [vmem:[%s2964_s1 + $0x304] ss:$-152 sm:$0xc] %vm3_vm0, %v207_v16   ;;  %696 = vrot.lane.b32.xlu0 %v1324_v13, %s1658_s29  ;;  %705 = vrot.lane.b32.xlu1 %v1327_v14, %s1659_s30 }
  0xa3   :  { %s1668_s29 = smov 37   ;;  %s1669_s30 = smov 36   ;;  %v1425_v13 = vld [vmem:[%s2963_s0 + $0x6] ss:$-3 sm:$0x7]  }
  0xa4   :  { %v216_v18 = vpop.permute.xlu0 %215   ;;  %v225_v19 = vpop.permute.xlu1 %224   ;;  %v2_v16 = vld [vmem:[%s2963_s0] ss:$3 sm:$0xf]  }
  0xa5   :  { %1172 = vst.msk [vmem:[%s2964_s1 + $0x16f] ss:$-156 sm:$0x3] %vm3_vm0, %v216_v18   ;;  %1173 = vst.msk [vmem:[%s2964_s1 + $0x39] sm:$0x4] %vm3_vm0, %v216_v18  }
  0xa6   :  { %1175 = vst.msk [vmem:[%s2964_s1 + $0x1a2] ss:$-152 sm:$0x3] %vm3_vm0, %v225_v19   ;;  %1176 = vst.msk [vmem:[%s2964_s1 + $0x6c] sm:$0x4] %vm3_vm0, %v225_v19   ;;  %714 = vrot.lane.b32.xlu0 %v1737_v5, %s1660_s12  ;;  %722 = vrot.lane.b32.xlu1 %v721_v17, %s1661_s13  ;;  %s1670_s12 = smov 35  }
  0xa7   :  { %s1671_s13 = smov 34   ;;  %4 = vst.msk [vmem:[%s2964_s1] ss:$152 sm:$0x7] %vm3_vm0, %v2_v16   ;;  %1107 = vst.msk [vmem:[%s2964_s1 + $0x1c9] sm:$0x8] %vm3_vm0, %v2_v16  }
  0xa8   :  { %v233_v21 = vpop.permute.xlu0 %232   ;;  %v242_v22 = vpop.permute.xlu1 %241  }
  0xa9   :  { %1177 = vst.msk [vmem:[%s2964_s1 + $0xa1] ss:$-152 sm:$0x3] %vm3_vm0, %v233_v21   ;;  %1178 = vst.msk [vmem:[%s2964_s1 + $0x305] ss:$-152 sm:$0xc] %vm3_vm0, %v233_v21  }
  0xaa   :  { %1180 = vst.msk [vmem:[%s2964_s1 + $0x170] ss:$-152 sm:$0x3] %vm3_vm0, %v242_v22   ;;  %1181 = vst.msk [vmem:[%s2964_s1 + $0x3a] sm:$0x4] %vm3_vm0, %v242_v22   ;;  %731 = vrot.lane.b32.xlu0 %v1335_v20, %s1662_s24  ;;  %740 = vrot.lane.b32.xlu1 %v1737_v5, %s1663_s25  ;;  %s1672_s24 = smov 33  }
  0xab   :  { %s1673_s25 = smov 32   ;;  %v1433_v20 = vld [vmem:[%s2963_s0 + $0x6] ss:$-3 sm:$0x7]  }
  0xac   :  { %v251_v24 = vpop.permute.xlu0 %250   ;;  %v259_v26 = vpop.permute.xlu1 %258  }
  0xad   :  { %1183 = vst.msk [vmem:[%s2964_s1 + $0x1a3] ss:$-152 sm:$0x3] %vm3_vm0, %v251_v24   ;;  %1184 = vst.msk [vmem:[%s2964_s1 + $0x6d] sm:$0x4] %vm3_vm0, %v251_v24  }
  0xae   :  { %1185 = vst.msk [vmem:[%s2964_s1 + $0xa2] ss:$-152 sm:$0x3] %vm3_vm0, %v259_v26   ;;  %1186 = vst.msk [vmem:[%s2964_s1 + $0x306] ss:$-152 sm:$0xc] %vm3_vm0, %v259_v26   ;;  %748 = vrot.lane.b32.xlu0 %v721_v17, %s1664_s7  ;;  %757 = vrot.lane.b32.xlu1 %v1343_v23, %s1665_s8 }
  0xb0   :  { %v268_v27 = vpop.permute.xlu0 %267   ;;  %v277_v28 = vpop.permute.xlu1 %276  }
  0xb1   :  { %1188 = vst.msk [vmem:[%s2964_s1 + $0x171] ss:$-152 sm:$0x3] %vm3_vm0, %v268_v27   ;;  %1189 = vst.msk [vmem:[%s2964_s1 + $0x3b] sm:$0x4] %vm3_vm0, %v268_v27  }
  0xb2   :  { %1191 = vst.msk [vmem:[%s2964_s1 + $0x1a4] ss:$-152 sm:$0x3] %vm3_vm0, %v277_v28   ;;  %1192 = vst.msk [vmem:[%s2964_s1 + $0x6e] sm:$0x4] %vm3_vm0, %v277_v28   ;;  %766 = vrot.lane.b32.xlu0 %v1737_v5, %s1666_s17  ;;  %774 = vrot.lane.b32.xlu1 %v721_v17, %s1667_s18  ;;  %s1686_s17 = smov 21  }
  0xb3   :  { %s1687_s18 = smov 20  }
  0xb4   :  { %v285_v30 = vpop.permute.xlu0 %284   ;;  %v294_v31 = vpop.permute.xlu1 %293  }
  0xb5   :  { %1193 = vst.msk [vmem:[%s2964_s1 + $0xa3] ss:$-152 sm:$0x3] %vm3_vm0, %v285_v30   ;;  %1194 = vst.msk [vmem:[%s2964_s1 + $0x307] ss:$-152 sm:$0xc] %vm3_vm0, %v285_v30  }
  0xb6   :  { %1196 = vst.msk [vmem:[%s2964_s1 + $0x172] ss:$-152 sm:$0x3] %vm3_vm0, %v294_v31   ;;  %1197 = vst.msk [vmem:[%s2964_s1 + $0x3c] sm:$0x4] %vm3_vm0, %v294_v31   ;;  %783 = vrot.lane.b32.xlu0 %v1351_v29, %s1668_s29  ;;  %792 = vrot.lane.b32.xlu1 %v1737_v5, %s1669_s30  ;;  %s1688_s29 = smov 19  }
  0xb7   :  { %s1689_s30 = smov 18  }
  0xb8   :  { %v303_v33 = vpop.permute.xlu0 %302   ;;  %v311_v34 = vpop.permute.xlu1 %310  }
  0xb9   :  { %1199 = vst.msk [vmem:[%s2964_s1 + $0x1a5] ss:$-152 sm:$0x3] %vm3_vm0, %v303_v33   ;;  %1200 = vst.msk [vmem:[%s2964_s1 + $0x6f] sm:$0x4] %vm3_vm0, %v303_v33  }
  0xba   :  { %1201 = vst.msk [vmem:[%s2964_s1 + $0x140] ss:$-152 sm:$0x3] %vm3_vm0, %v311_v34   ;;  %1202 = vst.msk [vmem:[%s2964_s1 - $0x38c] ss:$460 sm:$0xc] %vm3_vm0, %v311_v34   ;;  %800 = vrot.lane.b32.xlu0 %v721_v17, %s1670_s12  ;;  %809 = vrot.lane.b32.xlu1 %v1359_v32, %s1671_s13 }
  0xbb   :  { %s1675_s12 = smov 30   ;;  %s1681_s13 = smov 26   ;;  %v1430_v17 = vld [vmem:[%s2963_s0 + $0x8] ss:$-3 sm:$0x7]  }
  0xbc   :  { %v320_v36 = vpop.permute.xlu0 %319   ;;  %v329_v37 = vpop.permute.xlu1 %328  }
  0xbd   :  { %1204 = vst.msk [vmem:[%s2964_s1 + $0x173] ss:$-152 sm:$0x3] %vm3_vm0, %v320_v36   ;;  %1205 = vst.msk [vmem:[%s2964_s1 + $0x3d] sm:$0x4] %vm3_vm0, %v320_v36  }
  0xbe   :  { %1207 = vst.msk [vmem:[%s2964_s1 + $0x1a6] ss:$-152 sm:$0x3] %vm3_vm0, %v329_v37   ;;  %1208 = vst.msk [vmem:[%s2964_s1 + $0x70] sm:$0x4] %vm3_vm0, %v329_v37   ;;  %818 = vrot.lane.b32.xlu0 %v1737_v5, %s1672_s24  ;;  %826 = vrot.lane.b32.xlu1 %v2207_v35, %s1673_s25  ;;  %s1682_s24 = smov 25  }
  0xbf   :  { %s1683_s25 = smov 24  }
  0xc0   :  { %v337_v40 = vpop.permute.xlu0 %336   ;;  %v346_v41 = vpop.permute.xlu1 %345  }
  0xc1   :  { %1209 = vst.msk [vmem:[%s2964_s1 + $0x141] ss:$-152 sm:$0x3] %vm3_vm0, %v337_v40   ;;  %1210 = vst.msk [vmem:[%s2964_s1 - $0x38b] ss:$460 sm:$0xc] %vm3_vm0, %v337_v40  }
  0xc2   :  { %1212 = vst.msk [vmem:[%s2964_s1 + $0x40] ss:$308 sm:$0x3] %vm3_vm0, %v346_v41   ;;  %1213 = vst.msk [vmem:[%s2964_s1 + $0xda] sm:$0x4] %vm3_vm0, %v346_v41   ;;  %835 = vrot.lane.b32.xlu0 %v1367_v38, %s1674_s11  ;;  %844 = vrot.lane.b32.xlu1 %v1737_v5, %s1675_s12  ;;  %s1680_s12 = smov 27  }
  0xc3   :  { %s1691_s11 = smov 16  }
  0xc4   :  { %v355_v44 = vpop.permute.xlu0 %354   ;;  %v363_v45 = vpop.permute.xlu1 %362  }
  0xc5   :  { %1215 = vst.msk [vmem:[%s2964_s1 + $0x1a7] ss:$-152 sm:$0x3] %vm3_vm0, %v355_v44   ;;  %1216 = vst.msk [vmem:[%s2964_s1 + $0x71] sm:$0x4] %vm3_vm0, %v355_v44  }
  0xc6   :  { %1217 = vst.msk [vmem:[%s2964_s1 + $0x142] ss:$-152 sm:$0x3] %vm3_vm0, %v363_v45   ;;  %1218 = vst.msk [vmem:[%s2964_s1 - $0x38a] ss:$460 sm:$0xc] %vm3_vm0, %v363_v45   ;;  %1081 = vrot.lane.b32.xlu0 %v1080_v43, %s1676_s21  ;;  %1095 = vrot.lane.b32.xlu1 %v1094_v2, %s1677_s22 }
  0xc7   :  { %s1692_s22 = smov 15  }
  0xc8   :  { %v372_v47 = vpop.permute.xlu0 %371   ;;  %v381_v48 = vpop.permute.xlu1 %380  }
  0xc9   :  { %1220 = vst.msk [vmem:[%s2964_s1 + $0x41] ss:$308 sm:$0x3] %vm3_vm0, %v372_v47   ;;  %1221 = vst.msk [vmem:[%s2964_s1 + $0xdb] sm:$0x4] %vm3_vm0, %v372_v47  }
  0xca   :  { %1223 = vst.msk [vmem:[%s2964_s1 + $0x1a8] ss:$-152 sm:$0x7] %vm3_vm0, %v381_v48   ;;  %852 = vrot.lane.b32.xlu0 %v2207_v35, %s1678_s2  ;;  %861 = vrot.lane.b32.xlu1 %v1375_v46, %s1679_s3  ;;  %s1694_s3 = smov 13   ;;  %s1698_s2 = smov 9  }
  0xcc   :  { %v387_v49 = vpop.permute.xlu0 %386   ;;  %v396_v50 = vpop.permute.xlu1 %395  }
  0xcd   :  { %1224 = vst.msk [vmem:[%s2964_s1 + $0x143] ss:$-152 sm:$0x3] %vm3_vm0, %v387_v49   ;;  %1225 = vst.msk [vmem:[%s2964_s1 - $0x389] ss:$460 sm:$0xc] %vm3_vm0, %v387_v49  }
  0xce   :  { %1227 = vst.msk [vmem:[%s2964_s1 + $0x42] ss:$308 sm:$0x3] %vm3_vm0, %v396_v50   ;;  %1228 = vst.msk [vmem:[%s2964_s1 + $0xdc] sm:$0x4] %vm3_vm0, %v396_v50   ;;  %870 = vrot.lane.b32.xlu0 %v1737_v5, %s1680_s12  ;;  %878 = vrot.lane.b32.xlu1 %v2207_v35, %s1681_s13  ;;  %s1696_s13 = smov 11  }
  0xcf   :  { %v1383_v5 = vld [vmem:[%s2963_s0 + $0x7] ss:$-3 sm:$0x7]   ;;  %s1700_s12 = smov 7  }
  0xd0   :  { %v405_v52 = vpop.permute.xlu0 %404   ;;  %v412_v53 = vpop.permute.xlu1 %411  }
  0xd1   :  { %1230 = vst.msk [vmem:[%s2964_s1 + $0x1a9] ss:$-152 sm:$0x7] %vm3_vm0, %v405_v52   ;;  %1232 = vst.msk [vmem:[%s2964_s1 + $0x144] ss:$-152 sm:$0x3] %vm3_vm0, %v412_v53  }
  0xd2   :  { %1233 = vst.msk [vmem:[%s2964_s1 + $0xe] sm:$0x4] %vm3_vm0, %v412_v53   ;;  %887 = vrot.lane.b32.xlu0 %v1383_v5, %s1682_s24  ;;  %896 = vrot.lane.b32.xlu1 %v1386_v51, %s1683_s25  ;;  %s1702_s24 = smov 5   ;;  %s1703_s25 = smov 4  }
  0xd4   :  { %v421_v55 = vpop.permute.xlu0 %420   ;;  %v430_v56 = vpop.permute.xlu1 %429  }
  0xd5   :  { %1235 = vst.msk [vmem:[%s2964_s1 + $0x43] ss:$308 sm:$0x3] %vm3_vm0, %v421_v55   ;;  %1236 = vst.msk [vmem:[%s2964_s1 + $0xdd] sm:$0x4] %vm3_vm0, %v421_v55  }
  0xd6   :  { %1238 = vst.msk [vmem:[%s2964_s1 + $0x1aa] ss:$-152 sm:$0x7] %vm3_vm0, %v430_v56   ;;  %902 = vrot.lane.b32.xlu0 %v2207_v35, %s1684_s5  ;;  %911 = vrot.lane.b32.xlu1 %v1390_v54, %s1685_s6 }
  0xd8   :  { %v437_v58 = vpop.permute.xlu0 %436   ;;  %v446_v59 = vpop.permute.xlu1 %445  }
  0xd9   :  { %1240 = vst.msk [vmem:[%s2964_s1 + $0x145] ss:$-152 sm:$0x3] %vm3_vm0, %v437_v58   ;;  %1241 = vst.msk [vmem:[%s2964_s1 + $0xf] sm:$0x4] %vm3_vm0, %v437_v58  }
  0xda   :  { %1243 = vst.msk [vmem:[%s2964_s1 + $0xe0] ss:$-152 sm:$0x3] %vm3_vm0, %v446_v59   ;;  %1244 = vst.msk [vmem:[%s2964_s1 + $0x176] sm:$0x4] %vm3_vm0, %v446_v59   ;;  %920 = vrot.lane.b32.xlu0 %v1393_v57, %s1686_s17  ;;  %926 = vrot.lane.b32.xlu1 %v2207_v35, %s1687_s18 }
  0xdc   :  { %v455_v62 = vpop.permute.xlu0 %454   ;;  %v462_v63 = vpop.permute.xlu1 %461  }
  0xdd   :  { %1246 = vst.msk [vmem:[%s2964_s1 + $0x1ab] ss:$-152 sm:$0x7] %vm3_vm0, %v455_v62   ;;  %1248 = vst.msk [vmem:[%s2964_s1 + $0x146] ss:$-152 sm:$0x3] %vm3_vm0, %v462_v63  }
  0xde   :  { %1249 = vst.msk [vmem:[%s2964_s1 + $0x10] sm:$0x4] %vm3_vm0, %v462_v63   ;;  %935 = vrot.lane.b32.xlu0 %v1397_v60, %s1688_s29  ;;  %944 = vrot.lane.b32.xlu1 %v1400_v61, %s1689_s30 }
  0xe0   :  { %v471_v0 = vpop.permute.xlu0 %470   ;;  %v480_v1 = vpop.permute.xlu1 %479  }
  0xe1   :  { %1251 = vst.msk [vmem:[%s2964_s1 + $0xe1] ss:$-152 sm:$0x3] %vm3_vm0, %v471_v0   ;;  %1252 = vst.msk [vmem:[%s2964_s1 + $0x177] sm:$0x4] %vm3_vm0, %v471_v0  }
  0xe2   :  { %1254 = vst.msk [vmem:[%s2964_s1 + $0x1b0] ss:$-156 sm:$0x3] %vm3_vm0, %v480_v1   ;;  %1255 = vst.msk [vmem:[%s2964_s1 + $0x7a] sm:$0x4] %vm3_vm0, %v480_v1   ;;  %950 = vrot.lane.b32.xlu0 %v2207_v35, %s1690_s10  ;;  %959 = vrot.lane.b32.xlu1 %v1803_v25, %s1691_s11 }
  0xe4   :  { %v489_v4 = vpop.permute.xlu0 %488   ;;  %v498_v6 = vpop.permute.xlu1 %497  }
  0xe5   :  { %1257 = vst.msk [vmem:[%s2964_s1 + $0x147] ss:$-152 sm:$0x3] %vm3_vm0, %v489_v4   ;;  %1258 = vst.msk [vmem:[%s2964_s1 + $0x11] sm:$0x4] %vm3_vm0, %v489_v4  }
  0xe6   :  { %1260 = vst.msk [vmem:[%s2964_s1 + $0xe2] ss:$-152 sm:$0x3] %vm3_vm0, %v498_v6   ;;  %1261 = vst.msk [vmem:[%s2964_s1 + $0x178] sm:$0x4] %vm3_vm0, %v498_v6   ;;  %968 = vrot.lane.b32.xlu0 %v1407_v3, %s1692_s22  ;;  %974 = vrot.lane.b32.xlu1 %v2207_v35, %s1693_s23 }
  0xe8   :  { %v507_v8 = vpop.permute.xlu0 %506   ;;  %v516_v9 = vpop.permute.xlu1 %515  }
  0xe9   :  { %1263 = vst.msk [vmem:[%s2964_s1 + $0x1b1] ss:$-156 sm:$0x3] %vm3_vm0, %v507_v8   ;;  %1264 = vst.msk [vmem:[%s2964_s1 + $0x7b] sm:$0x4] %vm3_vm0, %v507_v8  }
  0xea   :  { %1266 = vst.msk [vmem:[%s2964_s1 + $0x148] ss:$-152 sm:$0x7] %vm3_vm0, %v516_v9   ;;  %983 = vrot.lane.b32.xlu0 %v1803_v25, %s1694_s3  ;;  %992 = vrot.lane.b32.xlu1 %v1414_v7, %s1695_s4  ;;  %s1699_s3 = smov 8   ;;  %s1704_s4 = smov 3  }
  0xec   :  { %v523_v10 = vpop.permute.xlu0 %522   ;;  %v532_v11 = vpop.permute.xlu1 %531  }
  0xed   :  { %1268 = vst.msk [vmem:[%s2964_s1 + $0xe3] ss:$-152 sm:$0x3] %vm3_vm0, %v523_v10   ;;  %1269 = vst.msk [vmem:[%s2964_s1 + $0x179] sm:$0x4] %vm3_vm0, %v523_v10  }
  0xee   :  { %1271 = vst.msk [vmem:[%s2964_s1 + $0x1b2] ss:$-156 sm:$0x3] %vm3_vm0, %v532_v11   ;;  %1272 = vst.msk [vmem:[%s2964_s1 + $0x7c] sm:$0x4] %vm3_vm0, %v532_v11   ;;  %1000 = vrot.lane.b32.xlu0 %v2207_v35, %s1696_s13  ;;  %1009 = vrot.lane.b32.xlu1 %v1803_v25, %s1697_s14  ;;  %s1701_s13 = smov 6  }
  0xf0   :  { %v541_v14 = vpop.permute.xlu0 %540   ;;  %v548_v15 = vpop.permute.xlu1 %547  }
  0xf1   :  { %1274 = vst.msk [vmem:[%s2964_s1 + $0x149] ss:$-152 sm:$0x7] %vm3_vm0, %v541_v14   ;;  %1276 = vst.msk [vmem:[%s2964_s1 + $0x180] ss:$-156 sm:$0x3] %vm3_vm0, %v548_v15  }
  0xf2   :  { %1277 = vst.msk [vmem:[%s2964_s1 + $0x4a] sm:$0x4] %vm3_vm0, %v548_v15   ;;  %1018 = vrot.lane.b32.xlu0 %v1422_v12, %s1698_s2  ;;  %1027 = vrot.lane.b32.xlu1 %v1425_v13, %s1699_s3 }
  0xf4   :  { %v557_v18 = vpop.permute.xlu0 %556   ;;  %v566_v19 = vpop.permute.xlu1 %565  }
  0xf5   :  { %1279 = vst.msk [vmem:[%s2964_s1 + $0x1b3] ss:$-156 sm:$0x3] %vm3_vm0, %v557_v18   ;;  %1280 = vst.msk [vmem:[%s2964_s1 + $0x7d] sm:$0x4] %vm3_vm0, %v557_v18  }
  0xf6   :  { %1282 = vst.msk [vmem:[%s2964_s1 + $0x14a] ss:$-152 sm:$0x7] %vm3_vm0, %v566_v19   ;;  %1034 = vrot.lane.b32.xlu0 %v1803_v25, %s1700_s12  ;;  %1043 = vrot.lane.b32.xlu1 %v1430_v17, %s1701_s13 }
  0xf8   :  { %v573_v21 = vpop.permute.xlu0 %572   ;;  %v582_v22 = vpop.permute.xlu1 %581  }
  0xf9   :  { %1284 = vst.msk [vmem:[%s2964_s1 + $0x181] ss:$-156 sm:$0x3] %vm3_vm0, %v573_v21   ;;  %1285 = vst.msk [vmem:[%s2964_s1 + $0x4b] sm:$0x4] %vm3_vm0, %v573_v21  }
  0xfa   :  { %1287 = vst.msk [vmem:[%s2964_s1 + $0x80] ss:$308 sm:$0x3] %vm3_vm0, %v582_v22   ;;  %1288 = vst.msk [vmem:[%s2964_s1 + $0x116] sm:$0x4] %vm3_vm0, %v582_v22   ;;  %1052 = vrot.lane.b32.xlu0 %v1433_v20, %s1702_s24  ;;  %1059 = vrot.lane.b32.xlu1 %v1803_v25, %s1703_s25 }
  0xfb   :  { %v1438_v25 = vld [vmem:[%s2963_s0 + $0x8] ss:$-3 sm:$0x7]  }
  0xfc   :  { %v591_v23 = vpop.permute.xlu0 %590   ;;  %v598_v24 = vpop.permute.xlu1 %597  }
  0xfd   :  { %1290 = vst.msk [vmem:[%s2964_s1 + $0x14b] ss:$-152 sm:$0x7] %vm3_vm0, %v591_v23   ;;  %1292 = vst.msk [vmem:[%s2964_s1 + $0x182] ss:$-156 sm:$0x3] %vm3_vm0, %v598_v24  }
  0xfe   :  { %1293 = vst.msk [vmem:[%s2964_s1 + $0x4c] sm:$0x4] %vm3_vm0, %v598_v24   ;;  %1068 = vrot.lane.b32.xlu0 %v1438_v25, %s1704_s4 }
 0x100   :  { %v607_v26 = vpop.permute.xlu0 %606   ;;  %v616_v27 = vpop.permute.xlu1 %615  }
 0x101   :  { %1295 = vst.msk [vmem:[%s2964_s1 + $0x81] ss:$308 sm:$0x3] %vm3_vm0, %v607_v26   ;;  %1296 = vst.msk [vmem:[%s2964_s1 + $0x117] sm:$0x4] %vm3_vm0, %v607_v26  }
 0x102   :  { %1298 = vst.msk [vmem:[%s2964_s1 + $0x150] ss:$-156 sm:$0x3] %vm3_vm0, %v616_v27   ;;  %1299 = vst.msk [vmem:[%s2964_s1 + $0x1a] sm:$0x4] %vm3_vm0, %v616_v27  }
 0x104   :  { %v625_v28 = vpop.permute.xlu0 %624   ;;  %v634_v29 = vpop.permute.xlu1 %633  }
 0x105   :  { %1301 = vst.msk [vmem:[%s2964_s1 + $0x183] ss:$-156 sm:$0x3] %vm3_vm0, %v625_v28   ;;  %1302 = vst.msk [vmem:[%s2964_s1 + $0x4d] sm:$0x4] %vm3_vm0, %v625_v28  }
 0x106   :  { %1304 = vst.msk [vmem:[%s2964_s1 + $0x82] ss:$308 sm:$0x3] %vm3_vm0, %v634_v29   ;;  %1305 = vst.msk [vmem:[%s2964_s1 + $0x118] sm:$0x4] %vm3_vm0, %v634_v29  }
 0x108   :  { %v643_v30 = vpop.permute.xlu0 %642   ;;  %v652_v31 = vpop.permute.xlu1 %651  }
 0x109   :  { %1307 = vst.msk [vmem:[%s2964_s1 + $0x151] ss:$-156 sm:$0x3] %vm3_vm0, %v643_v30   ;;  %1308 = vst.msk [vmem:[%s2964_s1 + $0x1b] sm:$0x4] %vm3_vm0, %v643_v30  }
 0x10a   :  { %1310 = vst.msk [vmem:[%s2964_s1 + $0x184] ss:$-156 sm:$0x3] %vm3_vm0, %v652_v31   ;;  %1311 = vst.msk [vmem:[%s2964_s1 + $0x4e] sm:$0x4] %vm3_vm0, %v652_v31  }
 0x10c   :  { %v661_v32 = vpop.permute.xlu0 %660   ;;  %v670_v33 = vpop.permute.xlu1 %669  }
 0x10d   :  { %1313 = vst.msk [vmem:[%s2964_s1 + $0x83] ss:$308 sm:$0x3] %vm3_vm0, %v661_v32   ;;  %1314 = vst.msk [vmem:[%s2964_s1 + $0x119] sm:$0x4] %vm3_vm0, %v661_v32  }
 0x10e   :  { %1316 = vst.msk [vmem:[%s2964_s1 + $0x152] ss:$-156 sm:$0x3] %vm3_vm0, %v670_v33   ;;  %1317 = vst.msk [vmem:[%s2964_s1 + $0x1c] sm:$0x4] %vm3_vm0, %v670_v33  }
 0x110   :  { %v679_v34 = vpop.permute.xlu0 %678   ;;  %v688_v35 = vpop.permute.xlu1 %687  }
 0x111   :  { %1319 = vst.msk [vmem:[%s2964_s1 + $0x185] ss:$-156 sm:$0x3] %vm3_vm0, %v679_v34   ;;  %1320 = vst.msk [vmem:[%s2964_s1 + $0x4f] sm:$0x4] %vm3_vm0, %v679_v34  }
 0x112   :  { %1322 = vst.msk [vmem:[%s2964_s1 + $0x120] ss:$-156 sm:$0x3] %vm3_vm0, %v688_v35   ;;  %1323 = vst.msk [vmem:[%s2964_s1 + $0x1b6] sm:$0x4] %vm3_vm0, %v688_v35  }
 0x114   :  { %v697_v36 = vpop.permute.xlu0 %696   ;;  %v706_v37 = vpop.permute.xlu1 %705  }
 0x115   :  { %1325 = vst.msk [vmem:[%s2964_s1 + $0x153] ss:$-156 sm:$0x3] %vm3_vm0, %v697_v36   ;;  %1326 = vst.msk [vmem:[%s2964_s1 + $0x1d] sm:$0x4] %vm3_vm0, %v697_v36  }
 0x116   :  { %1328 = vst.msk [vmem:[%s2964_s1 + $0x186] ss:$-156 sm:$0x3] %vm3_vm0, %v706_v37   ;;  %1329 = vst.msk [vmem:[%s2964_s1 + $0x50] sm:$0x4] %vm3_vm0, %v706_v37  }
 0x118   :  { %v715_v38 = vpop.permute.xlu0 %714   ;;  %v723_v39 = vpop.permute.xlu1 %722  }
 0x119   :  { %1331 = vst.msk [vmem:[%s2964_s1 + $0x121] ss:$-156 sm:$0x3] %vm3_vm0, %v715_v38   ;;  %1332 = vst.msk [vmem:[%s2964_s1 + $0x1b7] sm:$0x4] %vm3_vm0, %v715_v38  }
 0x11a   :  { %1333 = vst.msk [vmem:[%s2964_s1 + $0x20] ss:$308 sm:$0x3] %vm3_vm0, %v723_v39   ;;  %1334 = vst.msk [vmem:[%s2964_s1 + $0xb6] sm:$0x4] %vm3_vm0, %v723_v39  }
 0x11c   :  { %v732_v40 = vpop.permute.xlu0 %731   ;;  %v741_v41 = vpop.permute.xlu1 %740  }
 0x11d   :  { %1336 = vst.msk [vmem:[%s2964_s1 + $0x187] ss:$-156 sm:$0x3] %vm3_vm0, %v732_v40   ;;  %1337 = vst.msk [vmem:[%s2964_s1 + $0x51] sm:$0x4] %vm3_vm0, %v732_v40  }
 0x11e   :  { %1339 = vst.msk [vmem:[%s2964_s1 + $0x122] ss:$-156 sm:$0x3] %vm3_vm0, %v741_v41   ;;  %1340 = vst.msk [vmem:[%s2964_s1 + $0x1b8] sm:$0x4] %vm3_vm0, %v741_v41  }
 0x120   :  { %v749_v42 = vpop.permute.xlu0 %748   ;;  %v758_v43 = vpop.permute.xlu1 %757  }
 0x121   :  { %1341 = vst.msk [vmem:[%s2964_s1 + $0x21] ss:$308 sm:$0x3] %vm3_vm0, %v749_v42   ;;  %1342 = vst.msk [vmem:[%s2964_s1 + $0xb7] sm:$0x4] %vm3_vm0, %v749_v42  }
 0x122   :  { %1344 = vst.msk [vmem:[%s2964_s1 + $0x188] ss:$-152 sm:$0x3] %vm3_vm0, %v758_v43   ;;  %1345 = vst.msk [vmem:[%s2964_s1 + $0x52] sm:$0x4] %vm3_vm0, %v758_v43  }
 0x124   :  { %v767_v2 = vpop.permute.xlu0 %766   ;;  %v775_v44 = vpop.permute.xlu1 %774  }
 0x125   :  { %1347 = vst.msk [vmem:[%s2964_s1 + $0x123] ss:$-156 sm:$0x3] %vm3_vm0, %v767_v2   ;;  %1348 = vst.msk [vmem:[%s2964_s1 + $0x1b9] sm:$0x4] %vm3_vm0, %v767_v2  }
 0x126   :  { %1349 = vst.msk [vmem:[%s2964_s1 + $0x22] ss:$308 sm:$0x3] %vm3_vm0, %v775_v44   ;;  %1350 = vst.msk [vmem:[%s2964_s1 + $0xb8] sm:$0x4] %vm3_vm0, %v775_v44  }
 0x128   :  { %v784_v45 = vpop.permute.xlu0 %783   ;;  %v793_v46 = vpop.permute.xlu1 %792  }
 0x129   :  { %1352 = vst.msk [vmem:[%s2964_s1 + $0x189] ss:$-152 sm:$0x3] %vm3_vm0, %v784_v45   ;;  %1353 = vst.msk [vmem:[%s2964_s1 + $0x53] sm:$0x4] %vm3_vm0, %v784_v45  }
 0x12a   :  { %1355 = vst.msk [vmem:[%s2964_s1 + $0x124] ss:$-156 sm:$0x3] %vm3_vm0, %v793_v46   ;;  %1356 = vst.msk [vmem:[%s2964_s1 + $0x1ba] sm:$0x4] %vm3_vm0, %v793_v46  }
 0x12c   :  { %v801_v47 = vpop.permute.xlu0 %800   ;;  %v810_v48 = vpop.permute.xlu1 %809  }
 0x12d   :  { %1357 = vst.msk [vmem:[%s2964_s1 + $0x23] ss:$308 sm:$0x3] %vm3_vm0, %v801_v47   ;;  %1358 = vst.msk [vmem:[%s2964_s1 + $0xb9] sm:$0x4] %vm3_vm0, %v801_v47  }
 0x12e   :  { %1360 = vst.msk [vmem:[%s2964_s1 + $0x18a] ss:$-152 sm:$0x3] %vm3_vm0, %v810_v48   ;;  %1361 = vst.msk [vmem:[%s2964_s1 + $0x54] sm:$0x4] %vm3_vm0, %v810_v48  }
 0x130   :  { %v819_v49 = vpop.permute.xlu0 %818   ;;  %v827_v50 = vpop.permute.xlu1 %826  }
 0x131   :  { %1363 = vst.msk [vmem:[%s2964_s1 + $0x125] ss:$-156 sm:$0x3] %vm3_vm0, %v819_v49   ;;  %1364 = vst.msk [vmem:[%s2964_s1 + $0x1bb] sm:$0x4] %vm3_vm0, %v819_v49  }
 0x132   :  { %1365 = vst.msk [vmem:[%s2964_s1 + $0xc0] ss:$-156 sm:$0x3] %vm3_vm0, %v827_v50   ;;  %1366 = vst.msk [vmem:[%s2964_s1 + $0x156] sm:$0x4] %vm3_vm0, %v827_v50  }
 0x134   :  { %v836_v5 = vpop.permute.xlu0 %835   ;;  %v845_v51 = vpop.permute.xlu1 %844  }
 0x135   :  { %1368 = vst.msk [vmem:[%s2964_s1 + $0x18b] ss:$-152 sm:$0x3] %vm3_vm0, %v836_v5   ;;  %1369 = vst.msk [vmem:[%s2964_s1 + $0x55] sm:$0x4] %vm3_vm0, %v836_v5  }
 0x136   :  { %1371 = vst.msk [vmem:[%s2964_s1 + $0x126] ss:$-156 sm:$0x3] %vm3_vm0, %v845_v51   ;;  %1372 = vst.msk [vmem:[%s2964_s1 + $0x1bc] sm:$0x4] %vm3_vm0, %v845_v51  }
 0x138   :  { %v1082_v52 = vpop.permute.xlu0 %1081   ;;  %v1096_v53 = vpop.permute.xlu1 %1095  }
 0x139   :  { %1443 = vst.msk [vmem:[%s2964_s1 + $0x162] ss:$-152 sm:$0x7] %vm1083_vm3, %v1082_v52  }
 0x13a   :  { %1447 = vst.msk [vmem:[%s2964_s1 + $0x65] ss:$308 sm:$0x3] %vm1097_vm4, %v1096_v53   ;;  %1448 = vst.msk [vmem:[%s2964_s1 + $0xfb] sm:$0x4] %vm1097_vm4, %v1096_v53  }
 0x13b   :  { %1444 = vst.msk [vmem:[%s2964_s1 + $0x162] ss:$-152 sm:$0x7] %vm1086_vm5, %v1082_v52  }
 0x13c   :  { %1449 = vst.msk [vmem:[%s2964_s1 + $0x65] ss:$308 sm:$0x3] %vm1102_vm6, %v1096_v53   ;;  %1450 = vst.msk [vmem:[%s2964_s1 + $0xfb] sm:$0x4] %vm1102_vm6, %v1096_v53   ;;  %v853_v54 = vpop.permute.xlu0 %852   ;;  %v862_v55 = vpop.permute.xlu1 %861  }
 0x13d   :  { %1373 = vst.msk [vmem:[%s2964_s1 + $0xc1] ss:$-156 sm:$0x3] %vm3_vm0, %v853_v54   ;;  %1374 = vst.msk [vmem:[%s2964_s1 + $0x157] sm:$0x4] %vm3_vm0, %v853_v54  }
 0x13e   :  { %1376 = vst.msk [vmem:[%s2964_s1 + $0x18c] ss:$-152 sm:$0x3] %vm3_vm0, %v862_v55   ;;  %1377 = vst.msk [vmem:[%s2964_s1 + $0x56] sm:$0x4] %vm3_vm0, %v862_v55  }
 0x140   :  { %v871_v56 = vpop.permute.xlu0 %870   ;;  %v879_v57 = vpop.permute.xlu1 %878  }
 0x141   :  { %1379 = vst.msk [vmem:[%s2964_s1 + $0x127] ss:$-156 sm:$0x3] %vm3_vm0, %v871_v56   ;;  %1380 = vst.msk [vmem:[%s2964_s1 + $0x1bd] sm:$0x4] %vm3_vm0, %v871_v56  }
 0x142   :  { %1381 = vst.msk [vmem:[%s2964_s1 + $0xc2] ss:$-156 sm:$0x3] %vm3_vm0, %v879_v57   ;;  %1382 = vst.msk [vmem:[%s2964_s1 + $0x158] sm:$0x4] %vm3_vm0, %v879_v57  }
 0x144   :  { %v888_v58 = vpop.permute.xlu0 %887   ;;  %v897_v59 = vpop.permute.xlu1 %896  }
 0x145   :  { %1384 = vst.msk [vmem:[%s2964_s1 + $0x18d] ss:$-152 sm:$0x3] %vm3_vm0, %v888_v58   ;;  %1385 = vst.msk [vmem:[%s2964_s1 + $0x57] sm:$0x4] %vm3_vm0, %v888_v58  }
 0x146   :  { %1387 = vst.msk [vmem:[%s2964_s1 + $0x1c0] ss:$-152 sm:$0x7] %vm3_vm0, %v897_v59  }
 0x148   :  { %v903_v60 = vpop.permute.xlu0 %902   ;;  %v912_v61 = vpop.permute.xlu1 %911  }
 0x149   :  { %1388 = vst.msk [vmem:[%s2964_s1 + $0xc3] ss:$-156 sm:$0x3] %vm3_vm0, %v903_v60   ;;  %1389 = vst.msk [vmem:[%s2964_s1 + $0x159] sm:$0x4] %vm3_vm0, %v903_v60  }
 0x14a   :  { %1391 = vst.msk [vmem:[%s2964_s1 + $0x18e] ss:$-152 sm:$0x3] %vm3_vm0, %v912_v61   ;;  %1392 = vst.msk [vmem:[%s2964_s1 + $0x58] sm:$0x4] %vm3_vm0, %v912_v61  }
 0x14c   :  { %v921_v62 = vpop.permute.xlu0 %920   ;;  %v927_v63 = vpop.permute.xlu1 %926  }
 0x14d   :  { %1394 = vst.msk [vmem:[%s2964_s1 + $0x1c1] ss:$-152 sm:$0x7] %vm3_vm0, %v921_v62   ;;  %1395 = vst.msk [vmem:[%s2964_s1 + $0xc4] ss:$-156 sm:$0x3] %vm3_vm0, %v927_v63  }
 0x14e   :  { %1396 = vst.msk [vmem:[%s2964_s1 + $0x15a] sm:$0x4] %vm3_vm0, %v927_v63  }
 0x150   :  { %v936_v0 = vpop.permute.xlu0 %935   ;;  %v945_v1 = vpop.permute.xlu1 %944  }
 0x151   :  { %1398 = vst.msk [vmem:[%s2964_s1 + $0x18f] ss:$-152 sm:$0x3] %vm3_vm0, %v936_v0   ;;  %1399 = vst.msk [vmem:[%s2964_s1 + $0x59] sm:$0x4] %vm3_vm0, %v936_v0  }
 0x152   :  { %1401 = vst.msk [vmem:[%s2964_s1 + $0x1c2] ss:$-152 sm:$0x7] %vm3_vm0, %v945_v1  }
 0x154   :  { %v951_v3 = vpop.permute.xlu0 %950   ;;  %v960_v4 = vpop.permute.xlu1 %959  }
 0x155   :  { %1402 = vst.msk [vmem:[%s2964_s1 + $0xc5] ss:$-156 sm:$0x3] %vm3_vm0, %v951_v3   ;;  %1403 = vst.msk [vmem:[%s2964_s1 + $0x15b] sm:$0x4] %vm3_vm0, %v951_v3  }
 0x156   :  { %1405 = vst.msk [vmem:[%s2964_s1 + $0x60] ss:$304 sm:$0x3] %vm3_vm0, %v960_v4   ;;  %1406 = vst.msk [vmem:[%s2964_s1 + $0xf6] sm:$0x4] %vm3_vm0, %v960_v4  }
 0x158   :  { %v969_v6 = vpop.permute.xlu0 %968   ;;  %v975_v7 = vpop.permute.xlu1 %974  }
 0x159   :  { %1408 = vst.msk [vmem:[%s2964_s1 + $0x1c3] ss:$-152 sm:$0x7] %vm3_vm0, %v969_v6   ;;  %1409 = vst.msk [vmem:[%s2964_s1 + $0xc6] ss:$-156 sm:$0x3] %vm3_vm0, %v975_v7  }
 0x15a   :  { %1410 = vst.msk [vmem:[%s2964_s1 + $0x15c] sm:$0x4] %vm3_vm0, %v975_v7  }
 0x15c   :  { %v984_v8 = vpop.permute.xlu0 %983   ;;  %v993_v9 = vpop.permute.xlu1 %992  }
 0x15d   :  { %1412 = vst.msk [vmem:[%s2964_s1 + $0x61] ss:$304 sm:$0x3] %vm3_vm0, %v984_v8   ;;  %1413 = vst.msk [vmem:[%s2964_s1 + $0xf7] sm:$0x4] %vm3_vm0, %v984_v8  }
 0x15e   :  { %1415 = vst.msk [vmem:[%s2964_s1 + $0x1c8] ss:$-156 sm:$0x3] %vm3_vm0, %v993_v9   ;;  %1416 = vst.msk [vmem:[%s2964_s1 + $0x92] sm:$0x4] %vm3_vm0, %v993_v9  }
 0x160   :  { %v1001_v10 = vpop.permute.xlu0 %1000   ;;  %v1010_v11 = vpop.permute.xlu1 %1009  }
 0x161   :  { %1417 = vst.msk [vmem:[%s2964_s1 + $0xc7] ss:$-156 sm:$0x3] %vm3_vm0, %v1001_v10   ;;  %1418 = vst.msk [vmem:[%s2964_s1 + $0x15d] sm:$0x4] %vm3_vm0, %v1001_v10  }
 0x162   :  { %1420 = vst.msk [vmem:[%s2964_s1 + $0x62] ss:$304 sm:$0x3] %vm3_vm0, %v1010_v11   ;;  %1421 = vst.msk [vmem:[%s2964_s1 + $0xf8] sm:$0x4] %vm3_vm0, %v1010_v11  }
 0x164   :  { %v1019_v12 = vpop.permute.xlu0 %1018   ;;  %v1028_v13 = vpop.permute.xlu1 %1027  }
 0x165   :  { %1423 = vst.msk [vmem:[%s2964_s1 + $0x1c9] ss:$-156 sm:$0x3] %vm3_vm0, %v1019_v12   ;;  %1424 = vst.msk [vmem:[%s2964_s1 + $0x93] sm:$0x4] %vm3_vm0, %v1019_v12  }
 0x166   :  { %1426 = vst.msk [vmem:[%s2964_s1 + $0x160] ss:$-152 sm:$0x7] %vm3_vm0, %v1028_v13  }
 0x168   :  { %v1035_v14 = vpop.permute.xlu0 %1034   ;;  %v1044_v15 = vpop.permute.xlu1 %1043  }
 0x169   :  { %1428 = vst.msk [vmem:[%s2964_s1 + $0x63] ss:$304 sm:$0x3] %vm3_vm0, %v1035_v14   ;;  %1429 = vst.msk [vmem:[%s2964_s1 + $0xf9] sm:$0x4] %vm3_vm0, %v1035_v14  }
 0x16a   :  { %1431 = vst.msk [vmem:[%s2964_s1 + $0x1ca] ss:$-156 sm:$0x3] %vm3_vm0, %v1044_v15   ;;  %1432 = vst.msk [vmem:[%s2964_s1 + $0x94] sm:$0x4] %vm3_vm0, %v1044_v15  }
 0x16c   :  { %v1053_v16 = vpop.permute.xlu0 %1052   ;;  %v1060_v17 = vpop.permute.xlu1 %1059  }
 0x16d   :  { %1434 = vst.msk [vmem:[%s2964_s1 + $0x161] ss:$-152 sm:$0x7] %vm3_vm0, %v1053_v16   ;;  %1436 = vst.msk [vmem:[%s2964_s1 + $0x64] ss:$308 sm:$0x3] %vm3_vm0, %v1060_v17  }
 0x16e   :  { %1437 = vst.msk [vmem:[%s2964_s1 + $0xfa] sm:$0x4] %vm3_vm0, %v1060_v17  }
 0x170   :  { %v1069_v18 = vpop.permute.xlu0 %1068  }
 0x171   :  { %1439 = vst.msk [vmem:[%s2964_s1 + $0x1cb] ss:$-156 sm:$0x3] %vm3_vm0, %v1069_v18   ;;  %1440 = vst.msk [vmem:[%s2964_s1 + $0x95] sm:$0x4] %vm3_vm0, %v1069_v18  }

// kernel: generator_forward.1
= control target key start
LH: loop header
LB: loop body
LE: loop exit
PB: predicated region body
PF: predicated region fallthrough
CT: control target
= control target key end

     0   :  { %10 = vsyncpa [#allocation5], 0  ;;  %s614_s15 = smov [#allocation4]   ;;  %s707_s0 = inlined_call_operand.<no memory space> [shape: f32[1], index: 0, kind: input, shape index: {}]   ;;  %s708_s1 = inlined_call_operand.vmem [shape: f32[8,32], index: 1, kind: input, shape index: {}]   ;;  %s709_s2 = inlined_call_operand.hbm [shape: f32[32,1280], index: 2, kind: input, shape index: {}]   ;;  %s710_s3 = inlined_call_operand.vmem [shape: f32[1,1280], index: 3, kind: input, shape index: {}]   ;;  %s711_s4 = inlined_call_operand.vmem [shape: f32[8,1280], index: 4, kind: output, shape index: {}]  }
   0x1   :  { %s18_s16 = sshll.u32 %s614_s15, 4  ;;  %s590_s19 = scalar_lea.hbm %s709_s2, 5120  ;;  %s19_s16 = int_to_ptr.vmem [resolvable:$true] %s18_s16 }
   0x2   :  { %p591_p0 = scmp.ne.s32.totalorder %s709_s2, %s590_s19  ;;  %p594_p1 = scmp.lt.u32.totalorder %s590_s19, %s709_s2 }
   0x4   :  { %p596_p2 = pnand %p594_p1, %p591_p0 }
   0x6   :  { %599 = shalt.err (!%p596_p2)
}
   0x7   :  { %s600_s24 = scalar_lea.vmem %s19_s16, 5120  ;;  %p605_p4 = scmp.lt.s32.totalorder %s19_s16, %s19_s16 }
   0x8   :  { %p601_p3 = scmp.ne.s32.totalorder %s19_s16, %s600_s24  ;;  %p606_p5 = scmp.lt.s32.totalorder %s600_s24, %s600_s24 }
   0xa   :  { %p607_p6 = por %p606_p5, %p605_p4 }
   0xc   :  { %p608_p7 = pnand %p607_p6, %p601_p3 }
   0xe   :  { %611 = shalt.err (!%p608_p7)
}
   0xf   :  { %s615_s25 = smov 1280   ;;  %s616_s26 = smov 80  }
  0x10   :  { %24 = dma.hbm_to_vmem [thread:$0]  %s709_s2, 5120, %s19_s16, [#allocation5], %s615_s25, %s615_s25, %s616_s26  }
  0x11   :  { %612 = dma.done.wait [#allocation5], 5120  }
  0x12   :  { %613 = vsyncadd [#allocation5], 4294962176  ;;  %v617_v0 = vmov 0.0   ;;  %v32_v1 = vld [vmem:[#allocation4 + $0x8] sm:$0xff]  ;;  %v42_v2 = vld [vmem:[#allocation4 + $0x58] sm:$0xff]  ;;  %vm125_vm0 = vcmask 261120   ;;  %v75_v62 = vlaneseq }
  0x13   :  { %193 = vmatprep.mubr.f32.mxu0 %v617_v0  ;;  %264 = vmatprep.mubr.f32.mxu1 %v617_v0  ;;  %v31_v3 = vld [vmem:[#allocation4] sm:$0xff]  ;;  %v526_v4 = vpack.c.bf16 %v42_v2, %v32_v1  ;;  %v41_v5 = vld [vmem:[#allocation4 + $0x50] sm:$0xff]  ;;  %v52_v6 = vld [vmem:[#allocation4 + $0xa8] sm:$0xff] }
  0x14   :  { %v62_v7 = vld [vmem:[#allocation4 + $0xf8] sm:$0xff]  ;;  %v528_v8 = vpack.c.bf16 %v41_v5, %v31_v3  ;;  %v51_v10 = vld [vmem:[#allocation4 + $0xa0] sm:$0xff]  ;;  %v61_v11 = vld [vmem:[#allocation4 + $0xf0] sm:$0xff]  ;;  %v76_v63 = vshrl.u32 %v75_v62, 7 }
  0x15   :  { %v530_v9 = vpack.c.bf16 %v62_v7, %v52_v6  ;;  %v34_v12 = vld [vmem:[#allocation4 + $0x18] sm:$0xff]  ;;  %527 = vmatprep.subr.bf16.mxu0 %v526_v4  ;;  %v44_v13 = vld [vmem:[#allocation4 + $0x68] sm:$0xff]  ;;  %v33_v14 = vld [vmem:[#allocation4 + $0x10] sm:$0xff]  ;;  %v532_v15 = vpack.c.bf16 %v61_v11, %v51_v10 }
  0x16   :  { %529 = vmatpush1.bf16.msra.mxu0 %v528_v8  ;;  %v534_v16 = vpack.c.bf16 %v44_v13, %v34_v12  ;;  %v43_v17 = vld [vmem:[#allocation4 + $0x60] sm:$0xff]  ;;  %v36_v18 = vld [vmem:[#allocation4 + $0x28] sm:$0xff]  ;;  %v46_v19 = vld [vmem:[#allocation4 + $0x78] sm:$0xff]  ;;  %v77_v1 = vsub.s32 0, %v76_v63  ;;  %v81_v3 = vsub.s32 1, %v76_v63  ;;  %v85_v4 = vsub.s32 2, %v76_v63 }
  0x17   :  { %531 = vmatprep.subr.bf16.mxu0 %v530_v9  ;;  %v536_v20 = vpack.c.bf16 %v43_v17, %v33_v14  ;;  %v542_v21 = vpack.c.bf16 %v46_v19, %v36_v18  ;;  %v35_v22 = vld [vmem:[#allocation4 + $0x20] sm:$0xff]  ;;  %v45_v23 = vld [vmem:[#allocation4 + $0x70] sm:$0xff]  ;;  %v54_v24 = vld [vmem:[#allocation4 + $0xb8] sm:$0xff]  ;;  %v89_v6 = vsub.s32 3, %v76_v63  ;;  %v93_v12 = vsub.s32 4, %v76_v63 }
  0x18   :  { %535 = vmatprep.subr.bf16.mxu1 %v534_v16  ;;  %v64_v25 = vld [vmem:[#allocation4 + $0x108] sm:$0xff]  ;;  %v53_v26 = vld [vmem:[#allocation4 + $0xb0] sm:$0xff]  ;;  %v63_v27 = vld [vmem:[#allocation4 + $0x100] sm:$0xff]  ;;  %v544_v33 = vpack.c.bf16 %v45_v23, %v35_v22 }
  0x19   :  { %v30_v28 = vld [vmem:[%s708_s1] sm:$0xff]  ;;  %537 = vmatpush1.bf16.msra.mxu1 %v536_v20  ;;  %v538_v29 = vpack.c.bf16 %v64_v25, %v54_v24  ;;  %v540_v30 = vpack.c.bf16 %v63_v27, %v53_v26  ;;  %v56_v31 = vld [vmem:[#allocation4 + $0xc8] sm:$0xff]  ;;  %v66_v32 = vld [vmem:[#allocation4 + $0x118] sm:$0xff]  ;;  %v105_v24 = vsub.s32 7, %v76_v63 }
  0x1a   :  { %533 = vmatpush1.bf16.msra.mxu0 %v532_v15  ;;  %v55_v34 = vld [vmem:[#allocation4 + $0xc0] sm:$0xff]  ;;  %v38_v35 = vld [vmem:[#allocation4 + $0x38] sm:$0xff]  ;;  %v48_v36 = vld [vmem:[#allocation4 + $0x88] sm:$0xff]  ;;  %v546_v37 = vpack.c.bf16 %v66_v32, %v56_v31  ;;  %v97_v15 = vsub.s32 5, %v76_v63 }
  0x1b   :  { %543 = vmatprep.subr.bf16.mxu0 %v542_v21  ;;  %539 = vmatprep.subr.bf16.mxu1 %v538_v29  ;;  %v65_v38 = vld [vmem:[#allocation4 + $0x110] sm:$0xff]  ;;  %v550_v39 = vpack.c.bf16 %v48_v36, %v38_v35  ;;  %v47_v41 = vld [vmem:[#allocation4 + $0x80] sm:$0xff]  ;;  %v40_v42 = vld [vmem:[#allocation4 + $0x48] sm:$0xff]  ;;  %v101_v21 = vsub.s32 6, %v76_v63 }
  0x1c   :  { %v37_v40 = vld [vmem:[#allocation4 + $0x30] sm:$0xff]  ;;  %v50_v43 = vld [vmem:[#allocation4 + $0x98] sm:$0xff]  ;;  %v68_v46 = vld [vmem:[#allocation4 + $0x128] sm:$0xff]  ;;  %v548_v47 = vpack.c.bf16 %v65_v38, %v55_v34 }
  0x1d   :  { %521 = vmatmul.mubr.msk.f32.vlgmr.msra.gmra.mrb[0].mxu0 %vm125_vm0, %v30_v28  ;;  %541 = vmatpush1.bf16.msra.mxu1 %v540_v30  ;;  %v552_v44 = vpack.c.bf16 %v47_v41, %v37_v40  ;;  %v58_v45 = vld [vmem:[#allocation4 + $0xd8] sm:$0xff]  ;;  %v57_v49 = vld [vmem:[#allocation4 + $0xd0] sm:$0xff]  ;;  %v67_v50 = vld [vmem:[#allocation4 + $0x120] sm:$0xff]  ;;  %v558_v51 = vpack.c.bf16 %v50_v43, %v40_v42 }
  0x1e   :  { %545 = vmatpush1.bf16.msra.mxu0 %v544_v33  ;;  %335 = vmatprep.mubr.f32.mxu0 %v617_v0  ;;  %v554_v48 = vpack.c.bf16 %v68_v46, %v58_v45  ;;  %v39_v52 = vld [vmem:[#allocation4 + $0x40] sm:$0xff]  ;;  %v49_v53 = vld [vmem:[#allocation4 + $0x90] sm:$0xff]  ;;  %v60_v54 = vld [vmem:[#allocation4 + $0xe8] sm:$0xff]  ;;  %v556_v56 = vpack.c.bf16 %v67_v50, %v57_v49 }
  0x1f   :  { %547 = vmatprep.subr.bf16.mxu0 %v546_v37  ;;  %551 = vmatprep.subr.bf16.mxu1 %v550_v39  ;;  %v70_v55 = vld [vmem:[#allocation4 + $0x138] sm:$0xff]  ;;  %v560_v57 = vpack.c.bf16 %v49_v53, %v39_v52  ;;  %v59_v59 = vld [vmem:[#allocation4 + $0xe0] sm:$0xff]  ;;  %v69_v60 = vld [vmem:[#allocation4 + $0x130] sm:$0xff] }
  0x20   :  { %522 = vmatmul.mubr.msk.f32.vlgmr.msra.gmra.mrb[0].mxu1 %vm125_vm0, %v30_v28  ;;  %v562_v58 = vpack.c.bf16 %v70_v55, %v60_v54  ;;  %v564_v61 = vpack.c.bf16 %v69_v60, %v59_v59  ;;  %v71_v2 = vld [vmem:[%s710_s3] sm:$0xff]  ;;  %v72_v34 = vld [vmem:[%s710_s3 + $0x8] sm:$0x3] }
  0x21   :  { %553 = vmatpush1.bf16.msra.mxu1 %v552_v44  ;;  %406 = vmatprep.mubr.f32.mxu1 %v617_v0  ;;  %v78_v5 = vrot.slane %v71_v2, %v77_v1  ;;  %v82_v7 = vrot.slane %v71_v2, %v81_v3  ;;  %v86_v9 = vrot.slane %v71_v2, %v85_v4 }
  0x22   :  { %549 = vmatpush1.bf16.msra.mxu0 %v548_v47  ;;  %555 = vmatprep.subr.bf16.mxu1 %v554_v48  ;;  %v90_v13 = vrot.slane %v71_v2, %v89_v6  ;;  %v94_v22 = vrot.slane %v71_v2, %v93_v12  ;;  %v98_v26 = vrot.slane %v71_v2, %v97_v15 }
  0x23   :  { %559 = vmatprep.subr.bf16.mxu0 %v558_v51  ;;  %v102_v29 = vrot.slane %v71_v2, %v101_v21  ;;  %v106_v32 = vrot.slane %v71_v2, %v105_v24  ;;  %v110_v41 = vrot.slane %v72_v34, %v77_v1  ;;  %v114_v43 = vrot.slane %v72_v34, %v81_v3 }
  0x25   :  { %523 = vmatmul.mubr.msk.f32.vlgmr.msra.gmra.mrb[2].mxu0 %vm125_vm0, %v30_v28  ;;  %557 = vmatpush1.bf16.msra.mxu1 %v556_v56 }
  0x26   :  { %561 = vmatpush1.bf16.msra.mxu0 %v560_v57  ;;  %477 = vmatprep.mubr.f32.mxu0 %v617_v0  ;;  %v485_v0 = vstv %s707_s0 }
  0x27   :  { %563 = vmatprep.subr.bf16.mxu0 %v562_v58 }
  0x28   :  { %524 = vmatmul.mubr.msk.f32.vlgmr.msra.gmra.mrb[2].mxu1 %vm125_vm0, %v30_v28 }
  0x2a   :  { %565 = vmatpush1.bf16.msra.mxu0 %v564_v61 }
  0x2d   :  { %525 = vmatmul.mubr.msk.f32.vlgmr.msra.gmra.mrb[4].mxu0 %vm125_vm0, %v30_v28 }
  0xf0   :  { %v195_v8 = vpop.f32.mrb[0].mxu0 }
  0xf1   :  { %v196_v10 = vadd.f32 %v195_v8, %v78_v5  ;;  %v197_v11 = vpop.f32.mrb[1].mxu0 }
  0xf2   :  { %v198_v14 = vadd.f32 %v197_v11, %v82_v7 }
  0xf3   :  { %v486_v16 = vmul.f32 %v485_v0, %v196_v10  ;;  %v266_v17 = vpop.f32.mrb[0].mxu1 }
  0xf4   :  { %v487_v18 = vmul.f32 %v485_v0, %v198_v14  ;;  %v267_v19 = vadd.f32 %v266_v17, %v86_v9  ;;  %v268_v20 = vpop.f32.mrb[1].mxu1 }
  0xf5   :  { %570 = vtanh.f32 %v486_v16  ;;  %v269_v23 = vadd.f32 %v268_v20, %v90_v13 }
  0xf6   :  { %572 = vtanh.f32 %v487_v18  ;;  %v488_v25 = vmul.f32 %v485_v0, %v267_v19 }
  0xf7   :  { %v489_v27 = vmul.f32 %v485_v0, %v269_v23 }
  0xf8   :  { %574 = vtanh.f32 %v488_v25  ;;  %v337_v28 = vpop.f32.mrb[2].mxu0 }
  0xf9   :  { %v338_v30 = vadd.f32 %v337_v28, %v94_v22  ;;  %576 = vtanh.f32 %v489_v27  ;;  %v339_v31 = vpop.f32.mrb[3].mxu0 }
  0xfa   :  { %v340_v33 = vadd.f32 %v339_v31, %v98_v26 }
  0xfb   :  { %v490_v35 = vmul.f32 %v485_v0, %v338_v30  ;;  %v408_v36 = vpop.f32.mrb[2].mxu1 }
  0xfc   :  { %v491_v37 = vmul.f32 %v485_v0, %v340_v33  ;;  %v409_v38 = vadd.f32 %v408_v36, %v102_v29  ;;  %v410_v39 = vpop.f32.mrb[3].mxu1 }
  0xfd   :  { %578 = vtanh.f32 %v490_v35  ;;  %v411_v40 = vadd.f32 %v410_v39, %v106_v32 }
  0xfe   :  { %580 = vtanh.f32 %v491_v37  ;;  %v492_v42 = vmul.f32 %v485_v0, %v409_v38 }
  0xff   :  { %v571_v44 = vpop.eup %570  ;;  %v493_v45 = vmul.f32 %v485_v0, %v411_v40 }
 0x100   :  { %v573_v46 = vpop.eup %572  ;;  %506 = vst [vmem:[%s711_s4] sm:$0xff] %v571_v44  ;;  %582 = vtanh.f32 %v492_v42  ;;  %v479_v47 = vpop.f32.mrb[4].mxu0 }
 0x101   :  { %507 = vst [vmem:[%s711_s4 + $0x8] sm:$0xff] %v573_v46  ;;  %584 = vtanh.f32 %v493_v45  ;;  %v480_v48 = vadd.f32 %v479_v47, %v110_v41  ;;  %v481_v49 = vpop.f32.mrb[5].mxu0 }
 0x102   :  { %v575_v50 = vpop.eup %574  ;;  %v482_v51 = vadd.f32 %v481_v49, %v114_v43 }
 0x103   :  { %v577_v52 = vpop.eup %576  ;;  %508 = vst [vmem:[%s711_s4 + $0x10] sm:$0xff] %v575_v50  ;;  %v494_v53 = vmul.f32 %v485_v0, %v480_v48 }
 0x104   :  { %509 = vst [vmem:[%s711_s4 + $0x18] sm:$0xff] %v577_v52  ;;  %v495_v54 = vmul.f32 %v485_v0, %v482_v51 }
 0x105   :  { %586 = vtanh.f32 %v494_v53 }
 0x106   :  { %588 = vtanh.f32 %v495_v54 }
 0x107   :  { %v579_v55 = vpop.eup %578 }
 0x108   :  { %v581_v56 = vpop.eup %580  ;;  %510 = vst [vmem:[%s711_s4 + $0x20] sm:$0xff] %v579_v55 }
 0x109   :  { %511 = vst [vmem:[%s711_s4 + $0x28] sm:$0xff] %v581_v56 }
 0x10a   :  { %v583_v57 = vpop.eup %582 }
 0x10b   :  { %v585_v58 = vpop.eup %584  ;;  %512 = vst [vmem:[%s711_s4 + $0x30] sm:$0xff] %v583_v57 }
 0x10c   :  { %513 = vst [vmem:[%s711_s4 + $0x38] sm:$0xff] %v585_v58 }
 0x10f   :  { %v587_v59 = vpop.eup %586 }
 0x110   :  { %v589_v60 = vpop.eup %588  ;;  %514 = vst [vmem:[%s711_s4 + $0x40] sm:$0xff] %v587_v59 }
 0x111   :  { %515 = vst [vmem:[%s711_s4 + $0x48] sm:$0xff] %v589_v60 }
 0x112   :  { %520 = vsyncpa [#allocation5], 1 }

</bundles_post_ra>
